<compile_context>
chip_gen: v7x
topology: tpu7x:2x2x1
jax: 0.10.0
libtpu: 0.0.40
codegen_flags: <defaults>
</compile_context>

<pallas_src>
import functools

import jax
import jax.numpy as jnp
from jax import lax
from jax.experimental import pallas as pl
from jax.experimental.pallas import tpu as pltpu


def _disc_head_kernel(x_ref, w1_ref, b1_ref, w2_ref, out_ref):
    # x_ref  : (NB, TRi, Wp, C)  bf16  halo'd input row tile (TRi = TRo+5, Wp = W+2)
    # w1_ref : (9, C, C)         bf16  conv1 weights, (tap, cin, cout)
    # b1_ref : (1, C)            f32   conv1 bias
    # w2_ref : (16, C, n_class)  bf16  conv2 weights, (tap, cin, cout)
    # out_ref: (1, M2, n_class)  f32   M2 = NB*TRo*Wo conv2 outputs of this tile
    NB, TRi, Wp, C = x_ref.shape
    W = Wp - 2
    H1 = TRi - 2          # conv1 output rows needed by this tile (= TRo + 3)
    TRo = TRi - 5         # conv2 output rows produced by this tile
    Wo = W - 3
    M1 = NB * H1 * W
    M2 = NB * TRo * Wo

    x = x_ref[...]                                            # (NB, TRi, Wp, C) bf16

    # ---- Conv1 (3x3, stride 1, pad 1): 9 per-tap MXU dots, f32 accumulation ----
    acc1 = None
    for kh in range(3):
        for kw in range(3):
            xs = x[:, kh:kh + H1, kw:kw + W, :].reshape(M1, C)
            d = jnp.dot(xs, w1_ref[kh * 3 + kw],
                        preferred_element_type=jnp.float32)
            acc1 = d if acc1 is None else acc1 + d            # (M1, C) f32

    # ---- bias + LeakyReLU(0.2), kept in f32 (VPU) ----
    y = acc1 + b1_ref[...]
    y = jnp.where(y >= 0, y, 0.2 * y)
    y4 = y.astype(jnp.bfloat16).reshape(NB, H1, W, C)

    # ---- Conv2 (4x4, valid, no bias): 16 per-tap MXU dots, f32 accumulation ----
    acc2 = None
    for kh in range(4):
        for kw in range(4):
            ys = y4[:, kh:kh + TRo, kw:kw + Wo, :].reshape(M2, C)
            d = jnp.dot(ys, w2_ref[kh * 4 + kw],
                        preferred_element_type=jnp.float32)
            acc2 = d if acc2 is None else acc2 + d            # (M2, n_class) f32

    out_ref[0] = acc2.astype(out_ref.dtype)


def _pick_tiles(N, H, W, C):
    """Choose (NB images, TRo conv2-output rows) per grid step.

    Bounds the per-step working set (input slab bf16 + conv1 activations) to a
    few MiB, keeps >= 2 total grid steps whenever possible (v7x has 2 TCs),
    and allows the fused matmul M up to ~2048 rows to amortize per-step
    overhead."""
    Ho = H - 3
    Wp = W + 2
    # bytes per conv2-output row per image: input rows (bf16) + conv1 act (f32 + bf16)
    bytes_per_row = Wp * C * 2 + W * C * 4 + W * C * 2
    max_rows = max(1, (4 << 20) // max(1, bytes_per_row))
    TRo = max(1, min(Ho, max_rows, 64))
    R = -(-Ho // TRo)                         # row tiles per image
    NB = 1
    for d in range(1, N + 1):
        if N % d != 0:
            continue
        if d * (TRo + 3) * W > 2048:          # fused-M cap (review: raised to ~2048)
            continue
        if d > 1 and (N // d) * R < 2:        # keep >= 2 grid steps for megacore
            continue
        NB = d
    return NB, TRo, R


def _vmem_bytes(NB, TRo, W, C, n_class):
    """Rough per-step VMEM footprint (double-buffered blocks + intermediates)."""
    TRi, Wp, Wo, H1 = TRo + 5, W + 2, W - 3, TRo + 3
    M1, M2 = NB * H1 * W, NB * TRo * Wo
    x_blk = NB * TRi * Wp * C * 2
    w_blk = 9 * C * C * 2 + 16 * C * n_class * 2 + C * 4
    out_blk = M2 * 128 * 4                     # out VMEM buffer is lane-padded
    inter = M1 * C * 4 + M1 * C * 2 + M2 * 128 * 4 + 2 * x_blk
    return 2 * (x_blk + w_blk + out_blk) + inter


@functools.partial(jax.jit, static_argnames=("n_class",))
def discriminator_head(x_nchw, w1, b1, w2, *, n_class):
    """x_nchw: (N, C, H, W) f32. w1: (C, C, 3, 3), b1: (C,), w2: (n_class, C, 4, 4)
    in torch layouts. Returns (N*Ho*Wo, n_class), matching `head(x).view(-1, n_class)`.
    Note: matmul inputs are bf16 (f32 accumulation) — intentional for a GAN head."""
    N, C, H, W = x_nchw.shape
    assert H >= 4 and W >= 4, "conv2 (k=4, no pad) needs H, W >= 4"
    Ho, Wo = H - 3, W - 3
    Wp = W + 2

    NB, TRo, R = _pick_tiles(N, H, W, C)
    TRi = TRo + 5
    nblocks = N // NB
    M2 = NB * TRo * Wo
    Ho_pad = R * TRo
    extra = Ho_pad - Ho

    # Glue: NCHW -> NHWC, +1 spatial halo (plus bottom fill so the last row tile
    # is full), bf16 for the MXU.  Channels are NOT padded in HBM.
    x_nhwc = jnp.transpose(x_nchw, (0, 2, 3, 1))
    x_pad = jnp.pad(x_nhwc, ((0, 0), (1, 1 + extra), (1, 1), (0, 0))).astype(jnp.bfloat16)

    # Materialize halo'd row tiles: (R*N, TRi, Wp, C), row-tile major then image.
    x_rows = jnp.concatenate(
        [x_pad[:, r * TRo: r * TRo + TRi] for r in range(R)], axis=0)

    # conv1 weights (Cout, Cin, 3, 3) -> (9, Cin, Cout); conv2 -> (16, Cin, n_class).
    w1_t = jnp.transpose(w1, (2, 3, 1, 0)).reshape(9, C, C).astype(jnp.bfloat16)
    b1_t = b1.reshape(1, C).astype(jnp.float32)
    w2_t = jnp.transpose(w2, (2, 3, 1, 0)).reshape(16, C, n_class).astype(jnp.bfloat16)

    vmem_limit = min(48 * 1024 * 1024,
                     max(32 * 1024 * 1024, 2 * _vmem_bytes(NB, TRo, W, C, n_class)))

    out_blocks = pl.pallas_call(
        _disc_head_kernel,
        out_shape=jax.ShapeDtypeStruct((nblocks * R, M2, n_class), jnp.float32),
        grid_spec=pltpu.PrefetchScalarGridSpec(
            num_scalar_prefetch=0,
            grid=(nblocks, R),
            in_specs=[
                pl.BlockSpec((NB, TRi, Wp, C),
                             lambda i, r: (r * nblocks + i, 0, 0, 0)),
                # Constant-index weight blocks: DMA'd once, reused every step.
                pl.BlockSpec((9, C, C), lambda i, r: (0, 0, 0)),
                pl.BlockSpec((1, C), lambda i, r: (0, 0)),
                pl.BlockSpec((16, C, n_class), lambda i, r: (0, 0, 0)),
            ],
            out_specs=pl.BlockSpec((1, M2, n_class),
                                   lambda i, r: (i * R + r, 0, 0)),
        ),
        compiler_params=pltpu.CompilerParams(
            dimension_semantics=("parallel", "parallel"),
            vmem_limit_bytes=vmem_limit),
    )(x_rows, w1_t, b1_t, w2_t)

    # Reassemble: (nblocks, R, NB, TRo, Wo, K) -> NHWC -> NCHW -> torch .view(-1, K).
    out = out_blocks.reshape(nblocks, R, NB, TRo, Wo, n_class)
    out = jnp.transpose(out, (0, 2, 1, 3, 4, 5)).reshape(N, Ho_pad, Wo, n_class)
    out = out[:, :Ho]
    out_nchw = jnp.transpose(out, (0, 3, 1, 2))
    return out_nchw.reshape(-1, n_class)


def _reference(x_nchw, w1, b1, w2, n_class):
    """Module semantics with the same bf16-input / f32-accumulate numerics."""
    f32 = jnp.float32
    xb = x_nchw.astype(jnp.bfloat16).astype(f32)
    w1b = w1.astype(jnp.bfloat16).astype(f32)
    w2b = w2.astype(jnp.bfloat16).astype(f32)
    dn = lax.conv_dimension_numbers(xb.shape, w1b.shape, ("NCHW", "OIHW", "NCHW"))
    y = lax.conv_general_dilated(xb, w1b, (1, 1), ((1, 1), (1, 1)),
                                 dimension_numbers=dn,
                                 precision=lax.Precision.HIGHEST)
    y = y + b1.reshape(1, -1, 1, 1)
    y = jnp.where(y >= 0, y, 0.2 * y)
    yb = y.astype(jnp.bfloat16).astype(f32)
    dn2 = lax.conv_dimension_numbers(yb.shape, w2b.shape, ("NCHW", "OIHW", "NCHW"))
    z = lax.conv_general_dilated(yb, w2b, (1, 1), ((0, 0), (0, 0)),
                                 dimension_numbers=dn2,
                                 precision=lax.Precision.HIGHEST)
    return z.reshape(-1, n_class)


if __name__ == "__main__":
    # Small config consistent with the module: ndf=2 -> C = ndf*16 = 32.
    ndf = 2
    C = ndf * 16          # 32
    n_class = 4
    N, H, W = 2, 8, 8     # conv2 (k=4, no pad) -> 5x5 output patches
    Ho, Wo = H - 3, W - 3

    key = jax.random.PRNGKey(0)
    kx, k1, kb, k2 = jax.random.split(key, 4)
    x = jax.random.normal(kx, (N, C, H, W), jnp.float32)
    w1 = jax.random.normal(k1, (C, C, 3, 3), jnp.float32) * 0.05       # Conv2d(C, C, 3, 1, 1)
    b1 = jax.random.normal(kb, (C,), jnp.float32) * 0.05
    w2 = jax.random.normal(k2, (n_class, C, 4, 4), jnp.float32) * 0.05  # Conv2d(C, n_class, 4, bias=False)

    out = discriminator_head(x, w1, b1, w2, n_class=n_class)
    out = jax.block_until_ready(out)

    ref = _reference(x, w1, b1, w2, n_class)
    assert out.shape == (N * Ho * Wo, n_class), out.shape
    max_err = float(jnp.max(jnp.abs(out - ref)))
    assert jnp.allclose(out, ref, atol=1e-2, rtol=1e-2), max_err

    print("KERNEL_OK")
</pallas_src>

<mosaic_0001>
module attributes {stable_mosaic.version = 11 : i64} {
  func.func @_disc_head_kernel(%arg0: i32, %arg1: i32, %arg2: memref<1x10x10x32xbf16, #tpu.memory_space<vmem>>, %arg3: memref<9x32x32xbf16, #tpu.memory_space<vmem>>, %arg4: memref<1x32xf32, #tpu.memory_space<vmem>>, %arg5: memref<16x32x4xbf16, #tpu.memory_space<vmem>>, %arg6: memref<1x25x4xf32, #tpu.memory_space<vmem>>) attributes {dimension_semantics = [#tpu.dimension_semantics<parallel>, #tpu.dimension_semantics<parallel>], iteration_bounds = array<i64: 2, 1>, scalar_prefetch = 0 : i64, scratch_operands = 0 : i64, tpu.core_type = #tpu.core_type<tc>, window_params = [{transform_indices = @transform_0, window_bounds = array<i64: 1, 10, 10, 32>}, {pipeline_mode = #tpu.pipeline_mode<synchronous>, transform_indices = @transform_1, window_bounds = array<i64: 9, 32, 32>}, {pipeline_mode = #tpu.pipeline_mode<synchronous>, transform_indices = @transform_2, window_bounds = array<i64: 1, 32>}, {pipeline_mode = #tpu.pipeline_mode<synchronous>, transform_indices = @transform_3, window_bounds = array<i64: 16, 32, 4>}, {transform_indices = @transform_4, window_bounds = array<i64: 1, 25, 4>}]} {
    %c0 = arith.constant 0 : index
    %c0_0 = arith.constant 0 : index
    %c0_1 = arith.constant 0 : index
    %c0_2 = arith.constant 0 : index
    %0 = vector.load %arg2[%c0, %c0_0, %c0_1, %c0_2] : memref<1x10x10x32xbf16, #tpu.memory_space<vmem>>, vector<1x10x10x32xbf16>
    %1 = vector.extract_strided_slice %0 {offsets = [0, 0, 0, 0], sizes = [1, 8, 8, 32], strides = [1, 1, 1, 1]} : vector<1x10x10x32xbf16> to vector<1x8x8x32xbf16>
    %2 = vector.shape_cast %1 : vector<1x8x8x32xbf16> to vector<64x32xbf16>
    %c0_3 = arith.constant 0 : index
    %c0_4 = arith.constant 0 : index
    %c0_5 = arith.constant 0 : index
    %3 = vector.load %arg3[%c0_3, %c0_4, %c0_5] : memref<9x32x32xbf16, #tpu.memory_space<vmem>>, vector<1x32x32xbf16>
    %4 = vector.shape_cast %3 : vector<1x32x32xbf16> to vector<32x32xbf16>
    %cst = arith.constant dense<0.000000e+00> : vector<64x32xf32>
    %5 = tpu.matmul %2, %4, %cst {dimension_numbers = #tpu.dot_dimension_numbers<[1], [0], [0], [1], [0, 0, 1, 1], [], []>} : vector<64x32xbf16>, vector<32x32xbf16>, vector<64x32xf32> -> vector<64x32xf32>
    %6 = vector.extract_strided_slice %0 {offsets = [0, 0, 1, 0], sizes = [1, 8, 8, 32], strides = [1, 1, 1, 1]} : vector<1x10x10x32xbf16> to vector<1x8x8x32xbf16>
    %7 = vector.shape_cast %6 : vector<1x8x8x32xbf16> to vector<64x32xbf16>
    %c1 = arith.constant 1 : index
    %c0_6 = arith.constant 0 : index
    %c0_7 = arith.constant 0 : index
    %8 = vector.load %arg3[%c1, %c0_6, %c0_7] : memref<9x32x32xbf16, #tpu.memory_space<vmem>>, vector<1x32x32xbf16>
    %9 = vector.shape_cast %8 : vector<1x32x32xbf16> to vector<32x32xbf16>
    %cst_8 = arith.constant dense<0.000000e+00> : vector<64x32xf32>
    %10 = tpu.matmul %7, %9, %cst_8 {dimension_numbers = #tpu.dot_dimension_numbers<[1], [0], [0], [1], [0, 0, 1, 1], [], []>} : vector<64x32xbf16>, vector<32x32xbf16>, vector<64x32xf32> -> vector<64x32xf32>
    %11 = arith.addf %5, %10 : vector<64x32xf32>
    %12 = vector.extract_strided_slice %0 {offsets = [0, 0, 2, 0], sizes = [1, 8, 8, 32], strides = [1, 1, 1, 1]} : vector<1x10x10x32xbf16> to vector<1x8x8x32xbf16>
    %13 = vector.shape_cast %12 : vector<1x8x8x32xbf16> to vector<64x32xbf16>
    %c2 = arith.constant 2 : index
    %c0_9 = arith.constant 0 : index
    %c0_10 = arith.constant 0 : index
    %14 = vector.load %arg3[%c2, %c0_9, %c0_10] : memref<9x32x32xbf16, #tpu.memory_space<vmem>>, vector<1x32x32xbf16>
    %15 = vector.shape_cast %14 : vector<1x32x32xbf16> to vector<32x32xbf16>
    %cst_11 = arith.constant dense<0.000000e+00> : vector<64x32xf32>
    %16 = tpu.matmul %13, %15, %cst_11 {dimension_numbers = #tpu.dot_dimension_numbers<[1], [0], [0], [1], [0, 0, 1, 1], [], []>} : vector<64x32xbf16>, vector<32x32xbf16>, vector<64x32xf32> -> vector<64x32xf32>
    %17 = arith.addf %11, %16 : vector<64x32xf32>
    %18 = vector.extract_strided_slice %0 {offsets = [0, 1, 0, 0], sizes = [1, 8, 8, 32], strides = [1, 1, 1, 1]} : vector<1x10x10x32xbf16> to vector<1x8x8x32xbf16>
    %19 = vector.shape_cast %18 : vector<1x8x8x32xbf16> to vector<64x32xbf16>
    %c3 = arith.constant 3 : index
    %c0_12 = arith.constant 0 : index
    %c0_13 = arith.constant 0 : index
    %20 = vector.load %arg3[%c3, %c0_12, %c0_13] : memref<9x32x32xbf16, #tpu.memory_space<vmem>>, vector<1x32x32xbf16>
    %21 = vector.shape_cast %20 : vector<1x32x32xbf16> to vector<32x32xbf16>
    %cst_14 = arith.constant dense<0.000000e+00> : vector<64x32xf32>
    %22 = tpu.matmul %19, %21, %cst_14 {dimension_numbers = #tpu.dot_dimension_numbers<[1], [0], [0], [1], [0, 0, 1, 1], [], []>} : vector<64x32xbf16>, vector<32x32xbf16>, vector<64x32xf32> -> vector<64x32xf32>
    %23 = arith.addf %17, %22 : vector<64x32xf32>
    %24 = vector.extract_strided_slice %0 {offsets = [0, 1, 1, 0], sizes = [1, 8, 8, 32], strides = [1, 1, 1, 1]} : vector<1x10x10x32xbf16> to vector<1x8x8x32xbf16>
    %25 = vector.shape_cast %24 : vector<1x8x8x32xbf16> to vector<64x32xbf16>
    %c4 = arith.constant 4 : index
    %c0_15 = arith.constant 0 : index
    %c0_16 = arith.constant 0 : index
    %26 = vector.load %arg3[%c4, %c0_15, %c0_16] : memref<9x32x32xbf16, #tpu.memory_space<vmem>>, vector<1x32x32xbf16>
    %27 = vector.shape_cast %26 : vector<1x32x32xbf16> to vector<32x32xbf16>
    %cst_17 = arith.constant dense<0.000000e+00> : vector<64x32xf32>
    %28 = tpu.matmul %25, %27, %cst_17 {dimension_numbers = #tpu.dot_dimension_numbers<[1], [0], [0], [1], [0, 0, 1, 1], [], []>} : vector<64x32xbf16>, vector<32x32xbf16>, vector<64x32xf32> -> vector<64x32xf32>
    %29 = arith.addf %23, %28 : vector<64x32xf32>
    %30 = vector.extract_strided_slice %0 {offsets = [0, 1, 2, 0], sizes = [1, 8, 8, 32], strides = [1, 1, 1, 1]} : vector<1x10x10x32xbf16> to vector<1x8x8x32xbf16>
    %31 = vector.shape_cast %30 : vector<1x8x8x32xbf16> to vector<64x32xbf16>
    %c5 = arith.constant 5 : index
    %c0_18 = arith.constant 0 : index
    %c0_19 = arith.constant 0 : index
    %32 = vector.load %arg3[%c5, %c0_18, %c0_19] : memref<9x32x32xbf16, #tpu.memory_space<vmem>>, vector<1x32x32xbf16>
    %33 = vector.shape_cast %32 : vector<1x32x32xbf16> to vector<32x32xbf16>
    %cst_20 = arith.constant dense<0.000000e+00> : vector<64x32xf32>
    %34 = tpu.matmul %31, %33, %cst_20 {dimension_numbers = #tpu.dot_dimension_numbers<[1], [0], [0], [1], [0, 0, 1, 1], [], []>} : vector<64x32xbf16>, vector<32x32xbf16>, vector<64x32xf32> -> vector<64x32xf32>
    %35 = arith.addf %29, %34 : vector<64x32xf32>
    %36 = vector.extract_strided_slice %0 {offsets = [0, 2, 0, 0], sizes = [1, 8, 8, 32], strides = [1, 1, 1, 1]} : vector<1x10x10x32xbf16> to vector<1x8x8x32xbf16>
    %37 = vector.shape_cast %36 : vector<1x8x8x32xbf16> to vector<64x32xbf16>
    %c6 = arith.constant 6 : index
    %c0_21 = arith.constant 0 : index
    %c0_22 = arith.constant 0 : index
    %38 = vector.load %arg3[%c6, %c0_21, %c0_22] : memref<9x32x32xbf16, #tpu.memory_space<vmem>>, vector<1x32x32xbf16>
    %39 = vector.shape_cast %38 : vector<1x32x32xbf16> to vector<32x32xbf16>
    %cst_23 = arith.constant dense<0.000000e+00> : vector<64x32xf32>
    %40 = tpu.matmul %37, %39, %cst_23 {dimension_numbers = #tpu.dot_dimension_numbers<[1], [0], [0], [1], [0, 0, 1, 1], [], []>} : vector<64x32xbf16>, vector<32x32xbf16>, vector<64x32xf32> -> vector<64x32xf32>
    %41 = arith.addf %35, %40 : vector<64x32xf32>
    %42 = vector.extract_strided_slice %0 {offsets = [0, 2, 1, 0], sizes = [1, 8, 8, 32], strides = [1, 1, 1, 1]} : vector<1x10x10x32xbf16> to vector<1x8x8x32xbf16>
    %43 = vector.shape_cast %42 : vector<1x8x8x32xbf16> to vector<64x32xbf16>
    %c7 = arith.constant 7 : index
    %c0_24 = arith.constant 0 : index
    %c0_25 = arith.constant 0 : index
    %44 = vector.load %arg3[%c7, %c0_24, %c0_25] : memref<9x32x32xbf16, #tpu.memory_space<vmem>>, vector<1x32x32xbf16>
    %45 = vector.shape_cast %44 : vector<1x32x32xbf16> to vector<32x32xbf16>
    %cst_26 = arith.constant dense<0.000000e+00> : vector<64x32xf32>
    %46 = tpu.matmul %43, %45, %cst_26 {dimension_numbers = #tpu.dot_dimension_numbers<[1], [0], [0], [1], [0, 0, 1, 1], [], []>} : vector<64x32xbf16>, vector<32x32xbf16>, vector<64x32xf32> -> vector<64x32xf32>
    %47 = arith.addf %41, %46 : vector<64x32xf32>
    %48 = vector.extract_strided_slice %0 {offsets = [0, 2, 2, 0], sizes = [1, 8, 8, 32], strides = [1, 1, 1, 1]} : vector<1x10x10x32xbf16> to vector<1x8x8x32xbf16>
    %49 = vector.shape_cast %48 : vector<1x8x8x32xbf16> to vector<64x32xbf16>
    %c8 = arith.constant 8 : index
    %c0_27 = arith.constant 0 : index
    %c0_28 = arith.constant 0 : index
    %50 = vector.load %arg3[%c8, %c0_27, %c0_28] : memref<9x32x32xbf16, #tpu.memory_space<vmem>>, vector<1x32x32xbf16>
    %51 = vector.shape_cast %50 : vector<1x32x32xbf16> to vector<32x32xbf16>
    %cst_29 = arith.constant dense<0.000000e+00> : vector<64x32xf32>
    %52 = tpu.matmul %49, %51, %cst_29 {dimension_numbers = #tpu.dot_dimension_numbers<[1], [0], [0], [1], [0, 0, 1, 1], [], []>} : vector<64x32xbf16>, vector<32x32xbf16>, vector<64x32xf32> -> vector<64x32xf32>
    %53 = arith.addf %47, %52 : vector<64x32xf32>
    %c0_30 = arith.constant 0 : index
    %c0_31 = arith.constant 0 : index
    %54 = vector.load %arg4[%c0_30, %c0_31] : memref<1x32xf32, #tpu.memory_space<vmem>>, vector<1x32xf32>
    %55 = vector.broadcast %54 : vector<1x32xf32> to vector<64x32xf32>
    %56 = arith.addf %53, %55 : vector<64x32xf32>
    %cst_32 = arith.constant 0.000000e+00 : f32
    %57 = vector.broadcast %cst_32 : f32 to vector<64x32xf32>
    %58 = arith.cmpf oge, %56, %57 : vector<64x32xf32>
    %cst_33 = arith.constant 2.000000e-01 : f32
    %59 = vector.broadcast %cst_33 : f32 to vector<64x32xf32>
    %60 = arith.mulf %59, %56 : vector<64x32xf32>
    %61 = arith.select %58, %56, %60 : vector<64x32xi1>, vector<64x32xf32>
    %62 = arith.truncf %61 : vector<64x32xf32> to vector<64x32xbf16>
    %63 = vector.shape_cast %62 : vector<64x32xbf16> to vector<1x8x8x32xbf16>
    %64 = vector.extract_strided_slice %63 {offsets = [0, 0, 0, 0], sizes = [1, 5, 5, 32], strides = [1, 1, 1, 1]} : vector<1x8x8x32xbf16> to vector<1x5x5x32xbf16>
    %65 = vector.shape_cast %64 : vector<1x5x5x32xbf16> to vector<25x32xbf16>
    %c0_34 = arith.constant 0 : index
    %c0_35 = arith.constant 0 : index
    %c0_36 = arith.constant 0 : index
    %66 = vector.load %arg5[%c0_34, %c0_35, %c0_36] : memref<16x32x4xbf16, #tpu.memory_space<vmem>>, vector<1x32x4xbf16>
    %67 = vector.shape_cast %66 : vector<1x32x4xbf16> to vector<32x4xbf16>
    %cst_37 = arith.constant dense<0.000000e+00> : vector<25x4xf32>
    %68 = tpu.matmul %65, %67, %cst_37 {dimension_numbers = #tpu.dot_dimension_numbers<[1], [0], [0], [1], [0, 0, 1, 1], [], []>} : vector<25x32xbf16>, vector<32x4xbf16>, vector<25x4xf32> -> vector<25x4xf32>
    %69 = vector.extract_strided_slice %63 {offsets = [0, 0, 1, 0], sizes = [1, 5, 5, 32], strides = [1, 1, 1, 1]} : vector<1x8x8x32xbf16> to vector<1x5x5x32xbf16>
    %70 = vector.shape_cast %69 : vector<1x5x5x32xbf16> to vector<25x32xbf16>
    %c1_38 = arith.constant 1 : index
    %c0_39 = arith.constant 0 : index
    %c0_40 = arith.constant 0 : index
    %71 = vector.load %arg5[%c1_38, %c0_39, %c0_40] : memref<16x32x4xbf16, #tpu.memory_space<vmem>>, vector<1x32x4xbf16>
    %72 = vector.shape_cast %71 : vector<1x32x4xbf16> to vector<32x4xbf16>
    %cst_41 = arith.constant dense<0.000000e+00> : vector<25x4xf32>
    %73 = tpu.matmul %70, %72, %cst_41 {dimension_numbers = #tpu.dot_dimension_numbers<[1], [0], [0], [1], [0, 0, 1, 1], [], []>} : vector<25x32xbf16>, vector<32x4xbf16>, vector<25x4xf32> -> vector<25x4xf32>
    %74 = arith.addf %68, %73 : vector<25x4xf32>
    %75 = vector.extract_strided_slice %63 {offsets = [0, 0, 2, 0], sizes = [1, 5, 5, 32], strides = [1, 1, 1, 1]} : vector<1x8x8x32xbf16> to vector<1x5x5x32xbf16>
    %76 = vector.shape_cast %75 : vector<1x5x5x32xbf16> to vector<25x32xbf16>
    %c2_42 = arith.constant 2 : index
    %c0_43 = arith.constant 0 : index
    %c0_44 = arith.constant 0 : index
    %77 = vector.load %arg5[%c2_42, %c0_43, %c0_44] : memref<16x32x4xbf16, #tpu.memory_space<vmem>>, vector<1x32x4xbf16>
    %78 = vector.shape_cast %77 : vector<1x32x4xbf16> to vector<32x4xbf16>
    %cst_45 = arith.constant dense<0.000000e+00> : vector<25x4xf32>
    %79 = tpu.matmul %76, %78, %cst_45 {dimension_numbers = #tpu.dot_dimension_numbers<[1], [0], [0], [1], [0, 0, 1, 1], [], []>} : vector<25x32xbf16>, vector<32x4xbf16>, vector<25x4xf32> -> vector<25x4xf32>
    %80 = arith.addf %74, %79 : vector<25x4xf32>
    %81 = vector.extract_strided_slice %63 {offsets = [0, 0, 3, 0], sizes = [1, 5, 5, 32], strides = [1, 1, 1, 1]} : vector<1x8x8x32xbf16> to vector<1x5x5x32xbf16>
    %82 = vector.shape_cast %81 : vector<1x5x5x32xbf16> to vector<25x32xbf16>
    %c3_46 = arith.constant 3 : index
    %c0_47 = arith.constant 0 : index
    %c0_48 = arith.constant 0 : index
    %83 = vector.load %arg5[%c3_46, %c0_47, %c0_48] : memref<16x32x4xbf16, #tpu.memory_space<vmem>>, vector<1x32x4xbf16>
    %84 = vector.shape_cast %83 : vector<1x32x4xbf16> to vector<32x4xbf16>
    %cst_49 = arith.constant dense<0.000000e+00> : vector<25x4xf32>
    %85 = tpu.matmul %82, %84, %cst_49 {dimension_numbers = #tpu.dot_dimension_numbers<[1], [0], [0], [1], [0, 0, 1, 1], [], []>} : vector<25x32xbf16>, vector<32x4xbf16>, vector<25x4xf32> -> vector<25x4xf32>
    %86 = arith.addf %80, %85 : vector<25x4xf32>
    %87 = vector.extract_strided_slice %63 {offsets = [0, 1, 0, 0], sizes = [1, 5, 5, 32], strides = [1, 1, 1, 1]} : vector<1x8x8x32xbf16> to vector<1x5x5x32xbf16>
    %88 = vector.shape_cast %87 : vector<1x5x5x32xbf16> to vector<25x32xbf16>
    %c4_50 = arith.constant 4 : index
    %c0_51 = arith.constant 0 : index
    %c0_52 = arith.constant 0 : index
    %89 = vector.load %arg5[%c4_50, %c0_51, %c0_52] : memref<16x32x4xbf16, #tpu.memory_space<vmem>>, vector<1x32x4xbf16>
    %90 = vector.shape_cast %89 : vector<1x32x4xbf16> to vector<32x4xbf16>
    %cst_53 = arith.constant dense<0.000000e+00> : vector<25x4xf32>
    %91 = tpu.matmul %88, %90, %cst_53 {dimension_numbers = #tpu.dot_dimension_numbers<[1], [0], [0], [1], [0, 0, 1, 1], [], []>} : vector<25x32xbf16>, vector<32x4xbf16>, vector<25x4xf32> -> vector<25x4xf32>
    %92 = arith.addf %86, %91 : vector<25x4xf32>
    %93 = vector.extract_strided_slice %63 {offsets = [0, 1, 1, 0], sizes = [1, 5, 5, 32], strides = [1, 1, 1, 1]} : vector<1x8x8x32xbf16> to vector<1x5x5x32xbf16>
    %94 = vector.shape_cast %93 : vector<1x5x5x32xbf16> to vector<25x32xbf16>
    %c5_54 = arith.constant 5 : index
    %c0_55 = arith.constant 0 : index
    %c0_56 = arith.constant 0 : index
    %95 = vector.load %arg5[%c5_54, %c0_55, %c0_56] : memref<16x32x4xbf16, #tpu.memory_space<vmem>>, vector<1x32x4xbf16>
    %96 = vector.shape_cast %95 : vector<1x32x4xbf16> to vector<32x4xbf16>
    %cst_57 = arith.constant dense<0.000000e+00> : vector<25x4xf32>
    %97 = tpu.matmul %94, %96, %cst_57 {dimension_numbers = #tpu.dot_dimension_numbers<[1], [0], [0], [1], [0, 0, 1, 1], [], []>} : vector<25x32xbf16>, vector<32x4xbf16>, vector<25x4xf32> -> vector<25x4xf32>
    %98 = arith.addf %92, %97 : vector<25x4xf32>
    %99 = vector.extract_strided_slice %63 {offsets = [0, 1, 2, 0], sizes = [1, 5, 5, 32], strides = [1, 1, 1, 1]} : vector<1x8x8x32xbf16> to vector<1x5x5x32xbf16>
    %100 = vector.shape_cast %99 : vector<1x5x5x32xbf16> to vector<25x32xbf16>
    %c6_58 = arith.constant 6 : index
    %c0_59 = arith.constant 0 : index
    %c0_60 = arith.constant 0 : index
    %101 = vector.load %arg5[%c6_58, %c0_59, %c0_60] : memref<16x32x4xbf16, #tpu.memory_space<vmem>>, vector<1x32x4xbf16>
    %102 = vector.shape_cast %101 : vector<1x32x4xbf16> to vector<32x4xbf16>
    %cst_61 = arith.constant dense<0.000000e+00> : vector<25x4xf32>
    %103 = tpu.matmul %100, %102, %cst_61 {dimension_numbers = #tpu.dot_dimension_numbers<[1], [0], [0], [1], [0, 0, 1, 1], [], []>} : vector<25x32xbf16>, vector<32x4xbf16>, vector<25x4xf32> -> vector<25x4xf32>
    %104 = arith.addf %98, %103 : vector<25x4xf32>
    %105 = vector.extract_strided_slice %63 {offsets = [0, 1, 3, 0], sizes = [1, 5, 5, 32], strides = [1, 1, 1, 1]} : vector<1x8x8x32xbf16> to vector<1x5x5x32xbf16>
    %106 = vector.shape_cast %105 : vector<1x5x5x32xbf16> to vector<25x32xbf16>
    %c7_62 = arith.constant 7 : index
    %c0_63 = arith.constant 0 : index
    %c0_64 = arith.constant 0 : index
    %107 = vector.load %arg5[%c7_62, %c0_63, %c0_64] : memref<16x32x4xbf16, #tpu.memory_space<vmem>>, vector<1x32x4xbf16>
    %108 = vector.shape_cast %107 : vector<1x32x4xbf16> to vector<32x4xbf16>
    %cst_65 = arith.constant dense<0.000000e+00> : vector<25x4xf32>
    %109 = tpu.matmul %106, %108, %cst_65 {dimension_numbers = #tpu.dot_dimension_numbers<[1], [0], [0], [1], [0, 0, 1, 1], [], []>} : vector<25x32xbf16>, vector<32x4xbf16>, vector<25x4xf32> -> vector<25x4xf32>
    %110 = arith.addf %104, %109 : vector<25x4xf32>
    %111 = vector.extract_strided_slice %63 {offsets = [0, 2, 0, 0], sizes = [1, 5, 5, 32], strides = [1, 1, 1, 1]} : vector<1x8x8x32xbf16> to vector<1x5x5x32xbf16>
    %112 = vector.shape_cast %111 : vector<1x5x5x32xbf16> to vector<25x32xbf16>
    %c8_66 = arith.constant 8 : index
    %c0_67 = arith.constant 0 : index
    %c0_68 = arith.constant 0 : index
    %113 = vector.load %arg5[%c8_66, %c0_67, %c0_68] : memref<16x32x4xbf16, #tpu.memory_space<vmem>>, vector<1x32x4xbf16>
    %114 = vector.shape_cast %113 : vector<1x32x4xbf16> to vector<32x4xbf16>
    %cst_69 = arith.constant dense<0.000000e+00> : vector<25x4xf32>
    %115 = tpu.matmul %112, %114, %cst_69 {dimension_numbers = #tpu.dot_dimension_numbers<[1], [0], [0], [1], [0, 0, 1, 1], [], []>} : vector<25x32xbf16>, vector<32x4xbf16>, vector<25x4xf32> -> vector<25x4xf32>
    %116 = arith.addf %110, %115 : vector<25x4xf32>
    %117 = vector.extract_strided_slice %63 {offsets = [0, 2, 1, 0], sizes = [1, 5, 5, 32], strides = [1, 1, 1, 1]} : vector<1x8x8x32xbf16> to vector<1x5x5x32xbf16>
    %118 = vector.shape_cast %117 : vector<1x5x5x32xbf16> to vector<25x32xbf16>
    %c9 = arith.constant 9 : index
    %c0_70 = arith.constant 0 : index
    %c0_71 = arith.constant 0 : index
    %119 = vector.load %arg5[%c9, %c0_70, %c0_71] : memref<16x32x4xbf16, #tpu.memory_space<vmem>>, vector<1x32x4xbf16>
    %120 = vector.shape_cast %119 : vector<1x32x4xbf16> to vector<32x4xbf16>
    %cst_72 = arith.constant dense<0.000000e+00> : vector<25x4xf32>
    %121 = tpu.matmul %118, %120, %cst_72 {dimension_numbers = #tpu.dot_dimension_numbers<[1], [0], [0], [1], [0, 0, 1, 1], [], []>} : vector<25x32xbf16>, vector<32x4xbf16>, vector<25x4xf32> -> vector<25x4xf32>
    %122 = arith.addf %116, %121 : vector<25x4xf32>
    %123 = vector.extract_strided_slice %63 {offsets = [0, 2, 2, 0], sizes = [1, 5, 5, 32], strides = [1, 1, 1, 1]} : vector<1x8x8x32xbf16> to vector<1x5x5x32xbf16>
    %124 = vector.shape_cast %123 : vector<1x5x5x32xbf16> to vector<25x32xbf16>
    %c10 = arith.constant 10 : index
    %c0_73 = arith.constant 0 : index
    %c0_74 = arith.constant 0 : index
    %125 = vector.load %arg5[%c10, %c0_73, %c0_74] : memref<16x32x4xbf16, #tpu.memory_space<vmem>>, vector<1x32x4xbf16>
    %126 = vector.shape_cast %125 : vector<1x32x4xbf16> to vector<32x4xbf16>
    %cst_75 = arith.constant dense<0.000000e+00> : vector<25x4xf32>
    %127 = tpu.matmul %124, %126, %cst_75 {dimension_numbers = #tpu.dot_dimension_numbers<[1], [0], [0], [1], [0, 0, 1, 1], [], []>} : vector<25x32xbf16>, vector<32x4xbf16>, vector<25x4xf32> -> vector<25x4xf32>
    %128 = arith.addf %122, %127 : vector<25x4xf32>
    %129 = vector.extract_strided_slice %63 {offsets = [0, 2, 3, 0], sizes = [1, 5, 5, 32], strides = [1, 1, 1, 1]} : vector<1x8x8x32xbf16> to vector<1x5x5x32xbf16>
    %130 = vector.shape_cast %129 : vector<1x5x5x32xbf16> to vector<25x32xbf16>
    %c11 = arith.constant 11 : index
    %c0_76 = arith.constant 0 : index
    %c0_77 = arith.constant 0 : index
    %131 = vector.load %arg5[%c11, %c0_76, %c0_77] : memref<16x32x4xbf16, #tpu.memory_space<vmem>>, vector<1x32x4xbf16>
    %132 = vector.shape_cast %131 : vector<1x32x4xbf16> to vector<32x4xbf16>
    %cst_78 = arith.constant dense<0.000000e+00> : vector<25x4xf32>
    %133 = tpu.matmul %130, %132, %cst_78 {dimension_numbers = #tpu.dot_dimension_numbers<[1], [0], [0], [1], [0, 0, 1, 1], [], []>} : vector<25x32xbf16>, vector<32x4xbf16>, vector<25x4xf32> -> vector<25x4xf32>
    %134 = arith.addf %128, %133 : vector<25x4xf32>
    %135 = vector.extract_strided_slice %63 {offsets = [0, 3, 0, 0], sizes = [1, 5, 5, 32], strides = [1, 1, 1, 1]} : vector<1x8x8x32xbf16> to vector<1x5x5x32xbf16>
    %136 = vector.shape_cast %135 : vector<1x5x5x32xbf16> to vector<25x32xbf16>
    %c12 = arith.constant 12 : index
    %c0_79 = arith.constant 0 : index
    %c0_80 = arith.constant 0 : index
    %137 = vector.load %arg5[%c12, %c0_79, %c0_80] : memref<16x32x4xbf16, #tpu.memory_space<vmem>>, vector<1x32x4xbf16>
    %138 = vector.shape_cast %137 : vector<1x32x4xbf16> to vector<32x4xbf16>
    %cst_81 = arith.constant dense<0.000000e+00> : vector<25x4xf32>
    %139 = tpu.matmul %136, %138, %cst_81 {dimension_numbers = #tpu.dot_dimension_numbers<[1], [0], [0], [1], [0, 0, 1, 1], [], []>} : vector<25x32xbf16>, vector<32x4xbf16>, vector<25x4xf32> -> vector<25x4xf32>
    %140 = arith.addf %134, %139 : vector<25x4xf32>
    %141 = vector.extract_strided_slice %63 {offsets = [0, 3, 1, 0], sizes = [1, 5, 5, 32], strides = [1, 1, 1, 1]} : vector<1x8x8x32xbf16> to vector<1x5x5x32xbf16>
    %142 = vector.shape_cast %141 : vector<1x5x5x32xbf16> to vector<25x32xbf16>
    %c13 = arith.constant 13 : index
    %c0_82 = arith.constant 0 : index
    %c0_83 = arith.constant 0 : index
    %143 = vector.load %arg5[%c13, %c0_82, %c0_83] : memref<16x32x4xbf16, #tpu.memory_space<vmem>>, vector<1x32x4xbf16>
    %144 = vector.shape_cast %143 : vector<1x32x4xbf16> to vector<32x4xbf16>
    %cst_84 = arith.constant dense<0.000000e+00> : vector<25x4xf32>
    %145 = tpu.matmul %142, %144, %cst_84 {dimension_numbers = #tpu.dot_dimension_numbers<[1], [0], [0], [1], [0, 0, 1, 1], [], []>} : vector<25x32xbf16>, vector<32x4xbf16>, vector<25x4xf32> -> vector<25x4xf32>
    %146 = arith.addf %140, %145 : vector<25x4xf32>
    %147 = vector.extract_strided_slice %63 {offsets = [0, 3, 2, 0], sizes = [1, 5, 5, 32], strides = [1, 1, 1, 1]} : vector<1x8x8x32xbf16> to vector<1x5x5x32xbf16>
    %148 = vector.shape_cast %147 : vector<1x5x5x32xbf16> to vector<25x32xbf16>
    %c14 = arith.constant 14 : index
    %c0_85 = arith.constant 0 : index
    %c0_86 = arith.constant 0 : index
    %149 = vector.load %arg5[%c14, %c0_85, %c0_86] : memref<16x32x4xbf16, #tpu.memory_space<vmem>>, vector<1x32x4xbf16>
    %150 = vector.shape_cast %149 : vector<1x32x4xbf16> to vector<32x4xbf16>
    %cst_87 = arith.constant dense<0.000000e+00> : vector<25x4xf32>
    %151 = tpu.matmul %148, %150, %cst_87 {dimension_numbers = #tpu.dot_dimension_numbers<[1], [0], [0], [1], [0, 0, 1, 1], [], []>} : vector<25x32xbf16>, vector<32x4xbf16>, vector<25x4xf32> -> vector<25x4xf32>
    %152 = arith.addf %146, %151 : vector<25x4xf32>
    %153 = vector.extract_strided_slice %63 {offsets = [0, 3, 3, 0], sizes = [1, 5, 5, 32], strides = [1, 1, 1, 1]} : vector<1x8x8x32xbf16> to vector<1x5x5x32xbf16>
    %154 = vector.shape_cast %153 : vector<1x5x5x32xbf16> to vector<25x32xbf16>
    %c15 = arith.constant 15 : index
    %c0_88 = arith.constant 0 : index
    %c0_89 = arith.constant 0 : index
    %155 = vector.load %arg5[%c15, %c0_88, %c0_89] : memref<16x32x4xbf16, #tpu.memory_space<vmem>>, vector<1x32x4xbf16>
    %156 = vector.shape_cast %155 : vector<1x32x4xbf16> to vector<32x4xbf16>
    %cst_90 = arith.constant dense<0.000000e+00> : vector<25x4xf32>
    %157 = tpu.matmul %154, %156, %cst_90 {dimension_numbers = #tpu.dot_dimension_numbers<[1], [0], [0], [1], [0, 0, 1, 1], [], []>} : vector<25x32xbf16>, vector<32x4xbf16>, vector<25x4xf32> -> vector<25x4xf32>
    %158 = arith.addf %152, %157 : vector<25x4xf32>
    %c0_91 = arith.constant 0 : index
    %c0_92 = arith.constant 0 : index
    %c0_93 = arith.constant 0 : index
    %159 = vector.load %arg6[%c0_91, %c0_92, %c0_93] : memref<1x25x4xf32, #tpu.memory_space<vmem>>, vector<1x25x4xf32>
    %160 = vector.shape_cast %159 : vector<1x25x4xf32> to vector<25x4xf32>
    %161 = vector.shape_cast %158 : vector<25x4xf32> to vector<1x25x4xf32>
    tpu.vector_store %arg6[%c0_91, %c0_92, %c0_93], %161 {strides = array<i32>} : memref<1x25x4xf32, #tpu.memory_space<vmem>>, vector<1x25x4xf32>,
    return
  }
  func.func @transform_0(%arg0: i32, %arg1: i32) -> (i32, i32, i32, i32) {
    %c2_i32 = arith.constant 2 : i32
    %0 = arith.muli %arg1, %c2_i32 : i32
    %1 = arith.addi %0, %arg0 : i32
    %c0_i32 = arith.constant 0 : i32
    %c0_i32_0 = arith.constant 0 : i32
    %c0_i32_1 = arith.constant 0 : i32
    %c0_i32_2 = arith.constant 0 : i32
    return %1, %c0_i32, %c0_i32_0, %c0_i32_1 : i32, i32, i32, i32
  }
  func.func @transform_1(%arg0: i32, %arg1: i32) -> (i32, i32, i32) {
    %c0_i32 = arith.constant 0 : i32
    %c0_i32_0 = arith.constant 0 : i32
    %c0_i32_1 = arith.constant 0 : i32
    %c0_i32_2 = arith.constant 0 : i32
    return %c0_i32, %c0_i32_0, %c0_i32_1 : i32, i32, i32
  }
  func.func @transform_2(%arg0: i32, %arg1: i32) -> (i32, i32) {
    %c0_i32 = arith.constant 0 : i32
    %c0_i32_0 = arith.constant 0 : i32
    %c0_i32_1 = arith.constant 0 : i32
    return %c0_i32, %c0_i32_0 : i32, i32
  }
  func.func @transform_3(%arg0: i32, %arg1: i32) -> (i32, i32, i32) {
    %c0_i32 = arith.constant 0 : i32
    %c0_i32_0 = arith.constant 0 : i32
    %c0_i32_1 = arith.constant 0 : i32
    %c0_i32_2 = arith.constant 0 : i32
    return %c0_i32, %c0_i32_0, %c0_i32_1 : i32, i32, i32
  }
  func.func @transform_4(%arg0: i32, %arg1: i32) -> (i32, i32, i32) {
    %c1_i32 = arith.constant 1 : i32
    %0 = arith.muli %arg0, %c1_i32 : i32
    %1 = arith.addi %0, %arg1 : i32
    %c0_i32 = arith.constant 0 : i32
    %c0_i32_0 = arith.constant 0 : i32
    %c0_i32_1 = arith.constant 0 : i32
    return %1, %c0_i32, %c0_i32_0 : i32, i32, i32
  }
}

</mosaic_0001>

<bundles_post_ra>
// kernel: discriminator_head.1
= control target key start
LH: loop header
LB: loop body
LE: loop exit
PB: predicated region body
PF: predicated region fallthrough
CT: control target
= control target key end

     0   :  { %s5325_s15 = smov 0   ;;  %s5327_s16 = smov 0   ;;  %s6718_s0 = inlined_call_operand.vmem [shape: bf16[2,10,10,32], index: 0, kind: input, shape index: {}]   ;;  %s6719_s1 = inlined_call_operand.vmem [shape: bf16[9,32,32], index: 1, kind: input, shape index: {}]   ;;  %s6720_s2 = inlined_call_operand.vmem [shape: f32[1,32], index: 2, kind: input, shape index: {}]   ;;  %s6721_s3 = inlined_call_operand.vmem [shape: bf16[16,32,4], index: 3, kind: input, shape index: {}]   ;;  %s6722_s4 = inlined_call_operand.vmem [shape: f32[2,25,4], index: 4, kind: output, shape index: {}]  }
   0x1   :  { %s5329_s17 = smov 0  }
   0x2 LB: > { %s26_s18 = sadd.s32 1, %s5293_s16  ;;  %p4397_p0 = scmp.ge.s32.totalorder %s5297_s17, 1  ;;  %s5297_s17 = sphi %s5329_s17, %s14_s17   ;;  %s5293_s16 = sphi %s5327_s16, %s6812_s16   ;;  %s5289_s15 = sphi %s5325_s15, %s6811_s15  }
   0x3   : > { %p28_p1 = scmp.ge.s32.totalorder %s26_s18, 2  ;;  %p184_p2 = scmp.lt.s32.totalorder %s5297_s17, 3 }
   0x5   : > { %s6814_s18 = smov (%p28_p1, %s26_s18), 0  ;;  %p185_p3 = pnand %p4397_p0, %p184_p2 }
   0x7   : > { %188 = sbr.rel (%p185_p3) target bundleno = 814 (0x32e), region = 36 }
   0xe   : > { %v5216_v0 = vld [vmem:[%s6719_s1 + $0x10] sm:$0xff]   ;;  %p215_p4 = scmp.lt.s32.totalorder %s5289_s15, 1  ;;  %v5217_v1 = vld [vmem:[%s6719_s1 + $0x18] sm:$0xff]   ;;  %v5355_v2 = vld [vmem:[%s6719_s1] sm:$0xff]   ;;  %vm254_vm0 = vsmask.f32 3328 }
   0xf   : > { %4826 = vmatprep.subr.bf16.mxu0 %v5216_v0  ;;  %5062 = vmatprep.subr.bf16.mxu1 %v5216_v0  ;;  %vm255_vm1 = vsmask.f32 7440  ;;  %vm398_vm3 = vcmask 261120   ;;  %v5219_v59 = vld [vmem:[%s6719_s1 + $0x8] sm:$0xff]   ;;  %vm593_vm4 = vcmask 1042432   ;;  %vm594_vm5 = vcmask 1046532  }
  0x10   : > { %s6816_s15 = smov (!%p215_p4, %s5289_s15), 1  ;;  %4827 = vmatpush3.bf16.msra.mxu0 %v5216_v0  ;;  %5064 = vmatpush3.bf16.msra.mxu1 %v5216_v0  ;;  %vm5403_vm2 = vmor %vm254_vm0, %vm255_vm1  ;;  %v5221_v62 = vld [vmem:[%s6719_s1 + $0x20] sm:$0xff]   ;;  %vm4320_vm15 = vcmask 31744   ;;  %vm4324_vm0 = vcmask 24576  }
  0x11   : > { %4828 = vmatprep.subr.bf16.mxu0 %v5217_v1  ;;  %s5190_s23 = smul.u32 80, %s6816_s15  ;;  %5063 = vmatprep.subr.bf16.mxu1 %v5217_v1  ;;  %vm5505_vm6 = vmor %vm593_vm4, %vm594_vm5  ;;  %s4699_s11 = sshll.u32 %s6816_s15, 5 }
  0x12   : > { %s227_s14 = scalar_lea.vmem %s6722_s4, %s4699_s11 }
  0x13   : > { %s5360_s28 = scalar_lea.vmem %s6718_s0, %s5190_s23 }
  0x14   : > { %4829 = vmatpush3.bf16.msra.mxu0 %v5217_v1  ;;  %v5363_v3 = vld [vmem:[%s5360_s28] sm:$0xf]  ;;  %v5366_v4 = vld [vmem:[%s5360_s28 + $0x4] sm:$0x1]  ;;  %v5369_v5 = vld [vmem:[%s5360_s28 + $0x8] sm:$0xf]  ;;  %5065 = vmatpush3.bf16.msra.mxu1 %v5217_v1 }
  0x15   : > { %v5372_v6 = vld [vmem:[%s5360_s28 + $0xc] sm:$0x1]  ;;  %v5375_v7 = vld [vmem:[%s5360_s28 + $0x10] sm:$0xf]  ;;  %4838 = vmatprep.subr.bf16.mxu0 %v5355_v2  ;;  %v5379_v8 = vld [vmem:[%s5360_s28 + $0x14] sm:$0x1]  ;;  %v4415_v57 = vcombine.low %v5363_v3, %v5369_v5 }
  0x16   : > { %v5382_v9 = vld [vmem:[%s5360_s28 + $0x18] sm:$0xf]  ;;  %v258_v10 = vshrl.u32 %v5363_v3, 16  ;;  %v261_v11 = vshll.u32 %v5363_v3, 16  ;;  %v267_v12 = vshll.u32 %v5366_v4, 16  ;;  %v272_v13 = vshrl.u32 %v5369_v5, 16 }
  0x17   : > { %v5389_v14 = vld [vmem:[%s5360_s28 + $0x1c] sm:$0x1]  ;;  %v275_v15 = vshll.u32 %v5369_v5, 16  ;;  %v281_v16 = vshll.u32 %v5372_v6, 16  ;;  %v286_v17 = vshrl.u32 %v5375_v7, 16  ;;  %v289_v18 = vshll.u32 %v5375_v7, 16 }
  0x18   : > { %v260_v19 = vrot.slane %v258_v10, 4  ;;  %v263_v20 = vrot.slane %v261_v11, 5  ;;  %v269_v21 = vrot.slane %v267_v12, 5  ;;  %v274_v22 = vrot.slane %v272_v13, 4  ;;  %v5396_v27 = vld [vmem:[%s5360_s28 + $0x20] sm:$0xf] }
  0x19   : > { %v277_v23 = vrot.slane %v275_v15, 5  ;;  %v283_v24 = vrot.slane %v281_v16, 5  ;;  %v288_v25 = vrot.slane %v286_v17, 4  ;;  %v291_v26 = vrot.slane %v289_v18, 5  ;;  %v5422_v53 = vld [vmem:[%s5360_s28 + $0x24] sm:$0x1] }
  0x1a   : > { %v264_v28 = vor.u32 %v263_v20, %v260_v19  ;;  %v295_v29 = vshll.u32 %v5379_v8, 16  ;;  %v300_v30 = vshrl.u32 %v5382_v9, 16  ;;  %v303_v31 = vshll.u32 %v5382_v9, 16  ;;  %v5447_v63 = vld [vmem:[%s5360_s28 + $0x28] sm:$0xf] }
  0x1b   : > { %v278_v33 = vor.u32 %v277_v23, %v274_v22  ;;  %v292_v34 = vor.u32 %v291_v26, %v288_v25  ;;  %v309_v35 = vshll.u32 %v5389_v14, 16  ;;  %v314_v36 = vshrl.u32 %v5396_v27, 16  ;;  %v5459_v13 = vld [vmem:[%s5360_s28 + $0x30] sm:$0xf]  ;;  %v5464_v17 = vld [vmem:[%s5360_s28 + $0x34] sm:$0x1] }
  0x1c   : > { %v265_v37 = vrot.slane %v264_v28, 4  ;;  %v297_v38 = vrot.slane %v295_v29, 5  ;;  %v302_v39 = vrot.slane %v300_v30, 4  ;;  %v305_v40 = vrot.slane %v303_v31, 5  ;;  %v5488_v26 = vld [vmem:[%s5360_s28 + $0x3c] sm:$0x1] }
  0x1d   : > { %v279_v41 = vrot.slane %v278_v33, 4  ;;  %v293_v42 = vrot.slane %v292_v34, 4  ;;  %v311_v43 = vrot.slane %v309_v35, 5  ;;  %v316_v46 = vrot.slane %v314_v36, 4  ;;  %v5494_v31 = vld [vmem:[%s5360_s28 + $0x44] sm:$0x1] }
  0x1e   : > { %v270_v44 = vsel %vm5403_vm2, %v265_v37, %v269_v21  ;;  %v306_v45 = vor.u32 %v305_v40, %v302_v39  ;;  %v317_v47 = vshll.u32 %v5396_v27, 16  ;;  %v323_v56 = vshll.u32 %v5422_v53, 16  ;;  %v5481_v21 = vld [vmem:[%s5360_s28 + $0x38] sm:$0xf]  ;;  %v5498_v34 = vld [vmem:[%s5360_s28 + $0x40] sm:$0xf] }
  0x1f   : > { %v5414_v48 = vsel %vm5403_vm2, %v279_v41, %v283_v24  ;;  %v5418_v49 = vsel %vm5403_vm2, %v293_v42, %v297_v38  ;;  %v598_v60 = vrot.slane %v5366_v4, 5  ;;  %v602_v61 = vrot.slane %v5372_v6, 5  ;;  %v5454_v4 = vld [vmem:[%s5360_s28 + $0x2c] sm:$0x1] }
  0x20   : > { %v307_v50 = vrot.slane %v306_v45, 4  ;;  %v319_v51 = vrot.slane %v317_v47, 5  ;;  %v4405_v52 = vcombine.low %v270_v44, %v5414_v48  ;;  %v325_v1 = vrot.slane %v323_v56, 5  ;;  %v5224_v47 = vld [vmem:[%s6719_s1 + $0x28] sm:$0xff]  }
  0x21   : > { %v4427_v10 = vrot.slane %v5375_v7, 9  ;;  %v606_v11 = vrot.slane %v5379_v8, 5  ;;  %v4428_v6 = vrot.slane %v5382_v9, 9  ;;  %v610_v12 = vrot.slane %v5389_v14, 5  ;;  %v5237_v42 = vld [vmem:[%s6719_s1 + $0x68] sm:$0xff]  }
  0x22   : > { %v5426_v54 = vsel %vm5403_vm2, %v307_v50, %v311_v43  ;;  %v320_v55 = vor.u32 %v319_v51, %v316_v46  ;;  %4830 = vmatprep.mubr.msk.bf16.mxu0 %vm398_vm3, %v4405_v52  ;;  %v4425_v15 = vrot.slane %v5363_v3, 9  ;;  %v4426_v16 = vrot.slane %v5369_v5, 9 }
  0x23   : > { %v5434_v58 = vcombine.low %v5418_v49, %v5426_v54  ;;  %v5472_v18 = vcombine.low %v5396_v27, %v5447_v63  ;;  %v4429_v19 = vrot.slane %v5396_v27, 9  ;;  %v614_v20 = vrot.slane %v5422_v53, 5  ;;  %v5227_v53 = vld [vmem:[%s6719_s1 + $0x38] sm:$0xff]  }
  0x24   : > { %v321_v0 = vrot.slane %v320_v55, 4  ;;  %v4430_v22 = vrot.slane %v5447_v63, 9  ;;  %v328_v23 = vshrl.u32 %v5447_v63, 16  ;;  %v331_v24 = vshll.u32 %v5447_v63, 16 }
  0x25   : > { %4831 = vmatmul.mubr.msk.bf16.vlgmr.msra.gmra.mrb[0].mxu0 %vm398_vm3, %v5434_v58  ;;  %v618_v25 = vrot.slane %v5454_v4, 5  ;;  %v337_v28 = vshll.u32 %v5454_v4, 16  ;;  %v342_v29 = vshrl.u32 %v5459_v13, 16  ;;  %v345_v30 = vshll.u32 %v5459_v13, 16 }
  0x26   : > { %4839 = vmatpush3.bf16.msra.mxu0 %v5355_v2  ;;  %4842 = vmatprep.mubr.msk.bf16.mxu0 %vm398_vm3, %v4415_v57  ;;  %v5468_v2 = vcombine.low %v5375_v7, %v5382_v9  ;;  %v5478_v3 = vsel %vm5403_vm2, %v321_v0, %v325_v1  ;;  %v4431_v33 = vrot.slane %v5459_v13, 9  ;;  %v330_v35 = vrot.slane %v328_v23, 4 }
  0x27   : > { %4840 = vmatprep.subr.bf16.mxu0 %v5219_v59  ;;  %v333_v36 = vrot.slane %v331_v24, 5  ;;  %v351_v37 = vshll.u32 %v5464_v17, 16  ;;  %v622_v38 = vrot.slane %v5464_v17, 5  ;;  %v344_v39 = vrot.slane %v342_v29, 4  ;;  %v5226_v24 = vld [vmem:[%s6719_s1 + $0x30] sm:$0xff]  }
  0x28   : > { %v347_v40 = vrot.slane %v345_v30, 5  ;;  %v356_v41 = vshrl.u32 %v5481_v21, 16  ;;  %v339_v44 = vrot.slane %v337_v28, 5  ;;  %v359_v45 = vshll.u32 %v5481_v21, 16  ;;  %v249_v30 = vld [vmem:[%s5360_s28 + $0x4c] sm:$0x1] }
  0x29   : > { %v334_v43 = vor.u32 %v333_v36, %v330_v35  ;;  %v365_v46 = vshll.u32 %v5488_v26, 16  ;;  %v851_v52 = vshrl.u32 %v5498_v34, 16  ;;  %v854_v55 = vshll.u32 %v5498_v34, 16 }
  0x2a   : > { %4841 = vmatpush3.bf16.msra.mxu0 %v5219_v59  ;;  %v348_v50 = vor.u32 %v347_v40, %v344_v39  ;;  %v358_v51 = vrot.slane %v356_v41, 4  ;;  %v353_v57 = vrot.slane %v351_v37, 5  ;;  %v361_v59 = vrot.slane %v359_v45, 5 }
  0x2b   : > { %4850 = vmatprep.subr.bf16.mxu0 %v5221_v62  ;;  %v335_v56 = vrot.slane %v334_v43, 4  ;;  %v860_v0 = vshll.u32 %v5494_v31, 16  ;;  %v599_v1 = vsel %vm5505_vm6, %v4425_v15, %v598_v60  ;;  %v5523_v23 = vsel %vm5505_vm6, %v4426_v16, %v602_v61  ;;  %v5536_v61 = vld [vmem:[%s5360_s28 + $0x48] sm:$0xf] }
  0x2c   : > { %v853_v28 = vrot.slane %v851_v52, 4  ;;  %v856_v29 = vrot.slane %v854_v55, 5  ;;  %v349_v60 = vrot.slane %v348_v50, 4  ;;  %v362_v15 = vor.u32 %v361_v59, %v358_v51 }
  0x2d   : > { %v5533_v35 = vsel %vm5403_vm2, %v335_v56, %v339_v44  ;;  %v367_v36 = vrot.slane %v365_v46, 5  ;;  %v862_v39 = vrot.slane %v860_v0, 5  ;;  %v5545_v40 = vcombine.low %v5459_v13, %v5481_v21 }
  0x2e   : > { %v5540_v16 = vcombine.low %v5478_v3, %v5533_v35  ;;  %v857_v37 = vor.u32 %v856_v29, %v853_v28  ;;  %v4437_v41 = vcombine.low %v599_v1, %v5523_v23  ;;  %v363_v43 = vrot.slane %v362_v15, 4 }
  0x2f   : > { %v974_v44 = vrot.slane %v5494_v31, 5  ;;  %v1180_v46 = vshrl.u32 %v5536_v61, 16  ;;  %v1183_v50 = vshll.u32 %v5536_v61, 16  ;;  %v1189_v51 = vshll.u32 %v249_v30, 16 }
  0x30   : > { %v858_v45 = vrot.slane %v857_v37, 4  ;;  %4834 = vmatprep.mubr.msk.bf16.mxu1 %vm398_vm3, %v5540_v16  ;;  %v354_v52 = vsel %vm5403_vm2, %v349_v60, %v353_v57  ;;  %v5557_v55 = vsel %vm5403_vm2, %v363_v43, %v367_v36  ;;  %v4512_v56 = vrot.slane %v5536_v61, 9 }
  0x31   : > { %4843 = vmatmul.mubr.msk.bf16.vlgmr.msra.gmra.mrb[0].mxu0 %vm398_vm3, %v5468_v2  ;;  %v1291_v31 = vrot.slane %v249_v30, 5  ;;  %v4432_v59 = vrot.slane %v5481_v21, 9  ;;  %v5566_v1 = vcombine.low %v354_v52, %v5557_v55  ;;  %v1185_v28 = vrot.slane %v1183_v50, 5 }
  0x32   : > { %4851 = vmatpush3.bf16.msra.mxu0 %v5221_v62  ;;  %4846 = vmatprep.mubr.msk.bf16.mxu0 %vm398_vm3, %v5472_v18  ;;  %v4475_v62 = vrot.slane %v5498_v34, 9  ;;  %v5563_v0 = vsel %vm5403_vm2, %v858_v45, %v862_v39  ;;  %v1191_v29 = vrot.slane %v1189_v51, 5  ;;  %v607_v15 = vsel %vm5505_vm6, %v4427_v10, %v606_v11  ;;  %v5241_v39 = vld [vmem:[%s6719_s1 + $0x80] sm:$0xff]  }
  0x33   : > { %4852 = vmatprep.subr.bf16.mxu0 %v5224_v47  ;;  %v5574_v30 = vsel %vm5505_vm6, %v4512_v56, %v1291_v31  ;;  %4835 = vmatmul.mubr.msk.bf16.vlgmr.msra.gmra.mrb[0].mxu1 %vm398_vm3, %v5566_v1  ;;  %v611_v36 = vsel %vm5505_vm6, %v4428_v6, %v610_v12  ;;  %v615_v8 = vsel %vm5505_vm6, %v4429_v19, %v614_v20  ;;  %v626_v10 = vrot.slane %v5488_v26, 5  ;;  %v5229_v20 = vld [vmem:[%s6719_s1 + $0x40] sm:$0xff]  }
  0x34   : > { %v5570_v57 = vsel %vm5505_vm6, %v4475_v62, %v974_v44  ;;  %v619_v14 = vsel %vm5505_vm6, %v4430_v22, %v618_v25  ;;  %v5608_v6 = vcombine.low %v607_v15, %v611_v36  ;;  %v623_v32 = vsel %vm5505_vm6, %v4431_v33, %v622_v38  ;;  %v5232_v38 = vld [vmem:[%s6719_s1 + $0x48] sm:$0xff]  }
  0x35   : > { %v4517_v60 = vcombine.low %v5570_v57, %v5574_v30  ;;  %v5613_v12 = vcombine.low %v615_v8, %v619_v14  ;;  %v627_v22 = vsel %vm5505_vm6, %v4432_v59, %v626_v10  ;;  %v4451_v26 = vcombine.low %v5369_v5, %v5375_v7  ;;  %v5234_v5 = vld [vmem:[%s6719_s1 + $0x50] sm:$0xff]  }
  0x36   : > { %4853 = vmatpush3.bf16.msra.mxu0 %v5224_v47  ;;  %v1182_v47 = vrot.slane %v1180_v46, 4  ;;  %v5635_v25 = vcombine.low %v623_v32, %v627_v22  ;;  %v4452_v17 = vcombine.low %v5382_v9, %v5396_v27  ;;  %v4453_v33 = vcombine.low %v5447_v63, %v5459_v13  ;;  %v5235_v13 = vld [vmem:[%s6719_s1 + $0x58] sm:$0xff]   ;;  %v5741_v46 = vld [vmem:[%s6720_s2] ss:$0 sm:$0xff] }
  0x37   : > { %4862 = vmatprep.subr.bf16.mxu0 %v5226_v24  ;;  %v4454_v7 = vcombine.low %v5481_v21, %v5498_v34  ;;  %v4465_v9 = vcombine.low %v5414_v48, %v5418_v49  ;;  %v4466_v27 = vcombine.low %v5426_v54, %v5478_v3  ;;  %v4467_v63 = vcombine.low %v5533_v35, %v354_v52  ;;  %v5236_v48 = vld [vmem:[%s6719_s1 + $0x60] sm:$0xff]   ;;  %v5239_v35 = vld [vmem:[%s6719_s1 + $0x78] sm:$0xff]  }
  0x38   : > { %v1186_v37 = vor.u32 %v1185_v28, %v1182_v47  ;;  %v4468_v49 = vcombine.low %v5557_v55, %v5563_v0  ;;  %v4480_v54 = vcombine.low %v5523_v23, %v607_v15  ;;  %v4481_v3 = vcombine.low %v611_v36, %v615_v8  ;;  %v5238_v23 = vld [vmem:[%s6719_s1 + $0x70] sm:$0xff]  }
  0x39   : > { %4847 = vmatmul.mubr.msk.bf16.gmra.mrb[4].mxu0 %vm398_vm3, %v5545_v40  ;;  %v4482_v21 = vcombine.low %v619_v14, %v623_v32  ;;  %v4494_v62 = vcombine.low %v5498_v34, %v5536_v61  ;;  %v5299_v43 = vmov 1966171168   ;;  %v1454_v45 = vlaneseq }
  0x3a   : > { %4854 = vmatprep.mubr.msk.bf16.mxu0 %vm398_vm3, %v4437_v41  ;;  %v1187_v11 = vrot.slane %v1186_v37, 4  ;;  %v5735_v41 = vld [vmem:[%s6721_s3] sm:$0xff]   ;;  %v1452_v44 = vunpack.c.l.s4 %v5299_v43 }
  0x3b   : > { %v1455_v52 = vshrl.u32 %v1454_v45, 7 }
  0x3c   : > { %v1192_v19 = vsel %vm5403_vm2, %v1187_v11, %v1191_v29  ;;  %v1453_v51 = vunpack.c.0.s8 %v1452_v44 }
  0x3d   : > { %v5618_v4 = vcombine.low %v5563_v0, %v1192_v19 }
  0x41   : > { %4855 = vmatmul.mubr.msk.bf16.vlgmr.msra.gmra.mrb[0].mxu0 %vm398_vm3, %v5608_v6 }
  0x42   : > { %4863 = vmatpush3.bf16.msra.mxu0 %v5226_v24  ;;  %4858 = vmatprep.mubr.msk.bf16.mxu0 %vm398_vm3, %v5613_v12  ;;  %v4483_v24 = vcombine.low %v627_v22, %v5570_v57  ;;  %v5746_v57 = vsub.s32 %v1453_v51, %v1455_v52 }
  0x43   : > { %4864 = vmatprep.subr.bf16.mxu0 %v5227_v53 }
  0x46   : > { %4865 = vmatpush3.bf16.msra.mxu0 %v5227_v53 }
  0x47   : > { %4874 = vmatprep.subr.bf16.mxu0 %v5229_v20 }
  0x49   : > { %4859 = vmatmul.mubr.msk.bf16.gmra.mrb[4].mxu0 %vm398_vm3, %v5635_v25 }
  0x4a   : > { %4866 = vmatprep.mubr.msk.bf16.mxu0 %vm398_vm3, %v4451_v26 }
  0x51   : > { %4867 = vmatmul.mubr.msk.bf16.vlgmr.msra.gmra.mrb[0].mxu0 %vm398_vm3, %v4452_v17 }
  0x52   : > { %4875 = vmatpush3.bf16.msra.mxu0 %v5229_v20  ;;  %4870 = vmatprep.mubr.msk.bf16.mxu0 %vm398_vm3, %v4453_v33 }
  0x53   : > { %4876 = vmatprep.subr.bf16.mxu0 %v5232_v38 }
  0x56   : > { %4877 = vmatpush3.bf16.msra.mxu0 %v5232_v38 }
  0x57   : > { %4886 = vmatprep.subr.bf16.mxu0 %v5234_v5 }
  0x59   : > { %4871 = vmatmul.mubr.msk.bf16.gmra.mrb[4].mxu0 %vm398_vm3, %v4454_v7 }
  0x5a   : > { %4878 = vmatprep.mubr.msk.bf16.mxu0 %vm398_vm3, %v4465_v9 }
  0x61   : > { %4879 = vmatmul.mubr.msk.bf16.vlgmr.msra.gmra.mrb[0].mxu0 %vm398_vm3, %v4466_v27 }
  0x62   : > { %4887 = vmatpush3.bf16.msra.mxu0 %v5234_v5  ;;  %4882 = vmatprep.mubr.msk.bf16.mxu0 %vm398_vm3, %v4467_v63 }
  0x63   : > { %4888 = vmatprep.subr.bf16.mxu0 %v5235_v13 }
  0x66   : > { %4889 = vmatpush3.bf16.msra.mxu0 %v5235_v13 }
  0x67   : > { %4898 = vmatprep.subr.bf16.mxu0 %v5236_v48 }
  0x69   : > { %4883 = vmatmul.mubr.msk.bf16.gmra.mrb[4].mxu0 %vm398_vm3, %v4468_v49 }
  0x6a   : > { %4890 = vmatprep.mubr.msk.bf16.mxu0 %vm398_vm3, %v4480_v54 }
  0x71   : > { %4891 = vmatmul.mubr.msk.bf16.vlgmr.msra.gmra.mrb[0].mxu0 %vm398_vm3, %v4481_v3 }
  0x72   : > { %4899 = vmatpush3.bf16.msra.mxu0 %v5236_v48  ;;  %4894 = vmatprep.mubr.msk.bf16.mxu0 %vm398_vm3, %v4482_v21 }
  0x73   : > { %4900 = vmatprep.subr.bf16.mxu0 %v5237_v42 }
  0x76   : > { %4901 = vmatpush3.bf16.msra.mxu0 %v5237_v42 }
  0x77   : > { %4910 = vmatprep.subr.bf16.mxu0 %v5238_v23 }
  0x79   : > { %4895 = vmatmul.mubr.msk.bf16.gmra.mrb[4].mxu0 %vm398_vm3, %v4483_v24 }
  0x7a   : > { %4902 = vmatprep.mubr.msk.bf16.mxu0 %vm398_vm3, %v5468_v2  ;;  %v5242_v2 = vld [vmem:[%s6719_s1 + $0x88] sm:$0xff]  }
  0x81   : > { %4903 = vmatmul.mubr.msk.bf16.vlgmr.msra.gmra.mrb[0].mxu0 %vm398_vm3, %v5472_v18 }
  0x82   : > { %4911 = vmatpush3.bf16.msra.mxu0 %v5238_v23  ;;  %4906 = vmatprep.mubr.msk.bf16.mxu0 %vm398_vm3, %v5545_v40  ;;  %v5244_v40 = vld [vmem:[%s6721_s3 + $0x18] sm:$0xff]  }
  0x83   : > { %4912 = vmatprep.subr.bf16.mxu0 %v5239_v35 }
  0x86   : > { %4913 = vmatpush3.bf16.msra.mxu0 %v5239_v35 }
  0x87   : > { %4922 = vmatprep.subr.bf16.mxu0 %v5241_v39 }
  0x89   : > { %4907 = vmatmul.mubr.msk.bf16.gmra.mrb[4].mxu0 %vm398_vm3, %v4494_v62 }
  0x8a   : > { %4914 = vmatprep.mubr.msk.bf16.mxu0 %vm398_vm3, %v5434_v58 }
  0x91   : > { %4915 = vmatmul.mubr.msk.bf16.vlgmr.msra.gmra.mrb[0].mxu0 %vm398_vm3, %v5540_v16  ;;  %v5243_v16 = vld [vmem:[%s6721_s3 + $0x10] sm:$0xff]  }
  0x92   : > { %4923 = vmatpush3.bf16.msra.mxu0 %v5241_v39  ;;  %4918 = vmatprep.mubr.msk.bf16.mxu0 %vm398_vm3, %v5566_v1 }
  0x93   : > { %4924 = vmatprep.subr.bf16.mxu0 %v5242_v2  ;;  %4934 = vmatprep.subr.bf16.mxu1 %v5243_v16 }
  0x94   : > { %4935 = vmatpush3.bf16.msra.mxu1 %v5243_v16 }
  0x95   : > { %4936 = vmatprep.subr.bf16.mxu1 %v5244_v40 }
  0x96   : > { %4925 = vmatpush3.bf16.msra.mxu0 %v5242_v2 }
  0x98   : > { %4937 = vmatpush3.bf16.msra.mxu1 %v5244_v40 }
  0x99   : > { %4919 = vmatmul.mubr.msk.bf16.gmra.mrb[4].mxu0 %vm398_vm3, %v5618_v4  ;;  %4942 = vmatprep.subr.bf16.mxu1 %v5735_v41 }
  0x9a   : > { %4926 = vmatprep.mubr.msk.bf16.mxu0 %vm398_vm3, %v5608_v6 }
  0xa1   : > { %4927 = vmatmul.mubr.msk.bf16.vlgmr.msra.gmra.mrb[0].mxu0 %vm398_vm3, %v5613_v12 }
  0xa2   : > { %4930 = vmatprep.mubr.msk.bf16.mxu0 %vm398_vm3, %v5635_v25 }
  0xa9   : > { %4931 = vmatmul.mubr.msk.bf16.gmra.mrb[4].mxu0 %vm398_vm3, %v4517_v60 }
 0x106   : > { %v4836_v58 = vpop.f32.mrb[0].mxu1 }
 0x107   : > { %v461_v18 = vpop.f32.mrb[1].mxu1 }
 0x108   : > { %v5722_v34 = vpop.f32.mrb[2].mxu1 }
 0x109   : > { %v5724_v61 = vpop.f32.mrb[3].mxu1 }
 0x174   : > { %v4928_v50 = vpop.f32.mrb[0].mxu0 }
 0x175   : > { %v1397_v55 = vadd.f32 %v4928_v50, %v5741_v46  ;;  %v1349_v56 = vpop.f32.mrb[1].mxu0 }
 0x176   : > { %v1395_v31 = vadd.f32 %v5741_v46, %v1349_v56  ;;  %v4929_v59 = vpop.f32.mrb[2].mxu0 }
 0x177   : > { %vm1405_vm7 = vcmp.ge.f32.partialorder %v1397_v55, 0.0  ;;  %v1413_v0 = vmul.f32 0.2, %v1397_v55  ;;  %v1398_v1 = vadd.f32 %v4929_v59, %v5741_v46  ;;  %v1352_v47 = vpop.f32.mrb[3].mxu0 }
 0x178   : > { %vm1403_vm8 = vcmp.ge.f32.partialorder %v1395_v31, 0.0  ;;  %v1411_v28 = vmul.f32 0.2, %v1395_v31  ;;  %v1396_v29 = vadd.f32 %v5741_v46, %v1352_v47 }
 0x179   : > { %v1421_v30 = vsel %vm1405_vm7, %v1397_v55, %v1413_v0  ;;  %vm1406_vm9 = vcmp.ge.f32.partialorder %v1398_v1, 0.0  ;;  %v1414_v60 = vmul.f32 0.2, %v1398_v1 }
 0x17a   : > { %v4702_v15 = vpack.c.bf16 %v1421_v30, %v1421_v30  ;;  %v1419_v36 = vsel %vm1403_vm8, %v1395_v31, %v1411_v28  ;;  %vm1404_vm10 = vcmp.ge.f32.partialorder %v1396_v29, 0.0  ;;  %v1412_v37 = vmul.f32 0.2, %v1396_v29 }
 0x17b   : > { %v4700_v8 = vpack.c.bf16 %v1419_v36, %v1419_v36  ;;  %v1422_v14 = vsel %vm1406_vm9, %v1398_v1, %v1414_v60 }
 0x17c   : > { %v1503_v10 = vrot.slane %v4702_v15, %v5746_v57  ;;  %v4703_v11 = vpack.c.bf16 %v1422_v14, %v1422_v14  ;;  %v1420_v6 = vsel %vm1404_vm10, %v1396_v29, %v1412_v37  ;;  %v4932_v53 = vpop.f32.mrb[4].mxu0 }
 0x17d   : > { %v1457_v12 = vrot.slane %v4700_v8, %v5746_v57  ;;  %v4701_v19 = vpack.c.bf16 %v1420_v6, %v1420_v6  ;;  %v5066_v4 = vadd.f32 %v4932_v53, %v4836_v58  ;;  %v1365_v20 = vpop.f32.mrb[5].mxu0 }
 0x17e   : > { %v1504_v32 = vcombine.high %v1503_v10, %v1503_v10  ;;  %v5752_v22 = vrot.slane %v1503_v10, %v5746_v57  ;;  %v5067_v25 = vadd.f32 %v1365_v20, %v461_v18  ;;  %v4933_v26 = vpop.f32.mrb[6].mxu0  ;;  %v1526_v9 = vrot.slane %v4703_v11, %v5746_v57 }
 0x17f   : > { %v1458_v17 = vcombine.high %v1457_v12, %v1457_v12  ;;  %v5755_v33 = vrot.slane %v1457_v12, %v5746_v57  ;;  %v1480_v38 = vrot.slane %v4701_v19, %v5746_v57  ;;  %v1401_v5 = vadd.f32 %v5066_v4, %v5741_v46  ;;  %v1368_v7 = vpop.f32.mrb[7].mxu0 }
 0x180   : > { %v5761_v27 = vrot.slane %v1504_v32, %v5746_v57  ;;  %v5776_v54 = vcombine.high %v5752_v22, %v5752_v22  ;;  %v6726_v21 = vunpack.i.h.s16 %v5752_v22  ;;  %v5780_v42 = vrot.slane %v1526_v9, %v5746_v57 }
 0x181   : > { %v5765_v63 = vcombine.high %v5755_v33, %v5755_v33  ;;  %v5768_v13 = vrot.slane %v1458_v17, %v5746_v57  ;;  %v1567_v48 = vunpack.i.h.s16 %v5755_v33  ;;  %v5772_v49 = vrot.slane %v1480_v38, %v5746_v57 }
 0x182   : > { %vm1409_vm11 = vcmp.ge.f32.partialorder %v1401_v5, 0.0  ;;  %v1417_v3 = vmul.f32 0.2, %v1401_v5  ;;  %6759 = vst [vmem:[#allocation2_spill] sm:$0xff] %v5780_v42  ;;  %v1481_v23 = vcombine.high %v1480_v38, %v1480_v38  ;;  %v1399_v39 = vadd.f32 %v5067_v25, %v5741_v46 }
 0x183   : > { %v4547_v24 = vpack.i.b16 %v5772_v49, %v5765_v63  ;;  %v5068_v62 = vadd.f32 %v4933_v26, %v5722_v34  ;;  %v5069_v2 = vadd.f32 %v1368_v7, %v5724_v61  ;;  %v4537_v58 = vpack.i.b16 %v5768_v13, %v1567_v48 }
 0x184   : > { %v1425_v35 = vsel %vm1409_vm11, %v1401_v5, %v1417_v3  ;;  %v1572_v18 = vunpack.i.h.s16 %v5772_v49  ;;  %v1569_v16 = vunpack.i.h.s16 %v5768_v13  ;;  %v6724_v40 = vunpack.i.h.s16 %v5761_v27 }
 0x185   : > { %vm1407_vm12 = vcmp.ge.f32.partialorder %v1399_v39, 0.0  ;;  %v1415_v43 = vmul.f32 0.2, %v1399_v39  ;;  %v1402_v44 = vadd.f32 %v5068_v62, %v5741_v46  ;;  %v1400_v45 = vadd.f32 %v5069_v2, %v5741_v46 }
 0x186   : > { %v4706_v50 = vpack.c.bf16 %v1425_v35, %v1425_v35  ;;  %v1582_v51 = vunpack.i.h.s16 %v5780_v42  ;;  %v1595_v34 = vunpack.i.h.s16 %v5765_v63  ;;  %v6729_v61 = vunpack.i.h.s16 %v5776_v54 }
 0x187   : > { %v1423_v52 = vsel %vm1407_vm12, %v1399_v39, %v1415_v43  ;;  %vm1410_vm13 = vcmp.ge.f32.partialorder %v1402_v44, 0.0  ;;  %v1418_v55 = vmul.f32 0.2, %v1402_v44  ;;  %v5797_v56 = vpack.i.b16 %v5765_v63, %v1569_v16 }
 0x188   : > { %v5801_v31 = vcombine.high %v5772_v49, %v5772_v49  ;;  %v4704_v59 = vpack.c.bf16 %v1423_v52, %v1423_v52  ;;  %vm1408_vm14 = vcmp.ge.f32.partialorder %v1400_v45, 0.0  ;;  %v1416_v46 = vmul.f32 0.2, %v1400_v45 }
 0x189   : > { %v1426_v0 = vsel %vm1410_vm13, %v1402_v44, %v1418_v55  ;;  %v1607_v1 = vpack.i.b16 %v1572_v18, %v1595_v34  ;;  %v5810_v47 = vpack.i.b16 %v5761_v27, %v6726_v21  ;;  %v5815_v28 = vpack.i.b16 %v5776_v54, %v6724_v40 }
 0x18a   : > { %v1527_v29 = vcombine.high %v1526_v9, %v1526_v9  ;;  %v5818_v30 = vrot.slane %v1481_v23, %v5746_v57  ;;  %v2992_v60 = vrot.slane %v4706_v50, %v5746_v57  ;;  %v1549_v15 = vrot.slane %v4704_v59, %v5746_v57 }
 0x18b   : > { %v4707_v36 = vpack.c.bf16 %v1426_v0, %v1426_v0  ;;  %v1424_v37 = vsel %vm1408_vm14, %v1400_v45, %v1416_v46  ;;  %v5824_v8 = vpack.i.b16 %v1582_v51, %v6729_v61  ;;  %v1618_v14 = vcombine.low %v4537_v58, %v5797_v56 }
 0x18c   : > { %v1550_v10 = vcombine.high %v1549_v15, %v1549_v15  ;;  %v5828_v11 = vrot.slane %v1549_v15, %v5746_v57  ;;  %v4705_v6 = vpack.c.bf16 %v1424_v37, %v1424_v37  ;;  %v1619_v53 = vcombine.low %v1607_v1, %v5818_v30 }
 0x18d   : > { %v3671_v12 = vrot.slane %v4707_v36, %v5746_v57  ;;  %v1620_v19 = vcombine.low %v5801_v31, %v5810_v47  ;;  %v1621_v4 = vcombine.low %v5815_v28, %v5824_v8  ;;  %v1628_v20 = vrot.slane %v1618_v14, %v5746_v57 }
 0x18e   : > { %v5838_v32 = vrot.slane %v1527_v29, %v5746_v57  ;;  %v2993_v25 = vcombine.high %v2992_v60, %v2992_v60  ;;  %v2306_v26 = vrot.slane %v4705_v6, %v5746_v57  ;;  %v1635_v17 = vrot.slane %v1619_v53, %v5746_v57 }
 0x18f   : > { %v5843_v38 = vrot.slane %v2992_v60, %v5746_v57  ;;  %v3672_v5 = vcombine.high %v3671_v12, %v3671_v12  ;;  %v1642_v7 = vrot.slane %v1620_v19, %v5746_v57  ;;  %v1649_v9 = vrot.slane %v1621_v4, %v5746_v57 }
 0x190   : > { %v5848_v48 = vrot.slane %v1550_v10, %v5746_v57  ;;  %v5852_v3 = vcombine.high %v5828_v11, %v5828_v11  ;;  %v5855_v23 = vrot.slane %v3671_v12, %v5746_v57  ;;  %v1650_v35 = vcombine.low %v1628_v20, %v1635_v17 }
 0x191   : > { %v1786_v39 = vcombine.low %v5755_v33, %v5768_v13  ;;  %v5861_v62 = vcombine.high %v5780_v42, %v5780_v42  ;;  %v2307_v2 = vcombine.high %v2306_v26, %v2306_v26  ;;  %v1651_v58 = vcombine.low %v1642_v7, %v1649_v9 }
 0x192   : > { %v5864_v16 = vrot.slane %v2993_v25, %v5746_v57  ;;  %v5867_v43 = vrot.slane %v2306_v26, %v5746_v57  ;;  %v1658_v44 = vrot.slane %v1650_v35, %v5746_v57  ;;  %v6725_v45 = vunpack.i.h.s16 %v5828_v11 }
 0x193   : > { %v5873_v50 = vcombine.high %v5843_v38, %v5843_v38  ;;  %v5876_v33 = vrot.slane %v3672_v5, %v5746_v57  ;;  %v1665_v52 = vrot.slane %v1651_v58, %v5746_v57  ;;  %v5880_v55 = vpack.i.b16 %v5838_v32, %v1582_v51 }
 0x194   : > { %v5884_v59 = vcombine.high %v5855_v23, %v5855_v23  ;;  %v6723_v0 = vunpack.i.h.s16 %v5848_v48  ;;  %v5889_v1 = vunpack.i.h.s16 %v5852_v3  ;;  %v5892_v29 = vrot.slane %v2307_v2, %v5746_v57 }
 0x195   : > { %6760 = vst [vmem:[#allocation3_spill] sm:$0xff] %v5873_v50  ;;  %v1666_v60 = vcombine.low %v1658_v44, %v1665_v52  ;;  %v1667_v15 = vcombine.low %v5838_v32, %v5861_v62  ;;  %v6730_v51 = vunpack.i.h.s16 %v5818_v30  ;;  %v5899_v36 = vcombine.high %v5867_v43, %v5867_v43 }
 0x196   : > { %6761 = vst [vmem:[#allocation4_spill] sm:$0xff] %v5884_v59  ;;  %v5904_v37 = vpack.i.b16 %v5848_v48, %v6725_v45  ;;  %v5909_v14 = vpack.i.b16 %v5852_v3, %v6723_v0  ;;  %v5914_v10 = vpack.i.b16 %v5818_v30, %v1572_v18  ;;  %v1689_v53 = vrot.slane %v5889_v1, %v5746_v57 }
 0x197   : > { %4938 = vmatprep.mubr.msk.bf16.mxu1 %vm398_vm3, %v1666_v60  ;;  %v5923_v12 = vpack.i.b16 %v5801_v31, %v6730_v51  ;;  %v5927_v19 = vpack.i.b16 %v5780_v42, %v5776_v54  ;;  %v6728_v25 = vunpack.i.h.s16 %v5838_v32  ;;  %v5939_v26 = vrot.slane %v1667_v15, %v5746_v57 }
 0x198   : > { %v1668_v4 = vcombine.low %v5904_v37, %v5909_v14  ;;  %v1787_v20 = vcombine.low %v4547_v24, %v5914_v10  ;;  %v1796_v7 = vrot.slane %v1786_v39, %v5746_v57  ;;  %v1836_v2 = vcombine.low %v5828_v11, %v5848_v48 }
 0x199   : > { %6762 = vst [vmem:[#allocation5_spill] sm:$0xff] %v5939_v26  ;;  %v1788_v17 = vcombine.low %v5923_v12, %v5752_v22  ;;  %v1789_v5 = vcombine.low %v5761_v27, %v5927_v19  ;;  %v5953_v24 = vpack.i.b16 %v5861_v62, %v6728_v25  ;;  %v1704_v58 = vrot.slane %v1689_v53, %v5746_v57 }
 0x19a   : > { %v5947_v9 = vrot.slane %v1668_v4, %v5746_v57  ;;  %v1803_v35 = vrot.slane %v1787_v20, %v5746_v57  ;;  %v6727_v39 = vunpack.i.h.s16 %v5801_v31  ;;  %v1590_v4 = vunpack.i.l.s16 %v5852_v3 }
 0x19b   : > { %v1810_v44 = vrot.slane %v1788_v17, %v5746_v57  ;;  %v1817_v52 = vrot.slane %v1789_v5, %v5746_v57  ;;  %v1941_v20 = vcombine.high %v5768_v13, %v5768_v13  ;;  %v1835_v18 = vcombine.low %v5880_v55, %v5953_v24 }
 0x19c   : > { %v1690_v60 = vcombine.low %v5939_v26, %v5947_v9  ;;  %v1818_v15 = vcombine.low %v1796_v7, %v1803_v35  ;;  %v5970_v53 = vcombine.high %v5818_v30, %v5818_v30  ;;  %v5974_v17 = vcombine.high %v5761_v27, %v5761_v27 }
 0x19d   : > { %v1819_v0 = vcombine.low %v1810_v44, %v1817_v52  ;;  %v1850_v35 = vrot.slane %v1836_v2, %v5746_v57  ;;  %v4561_v40 = vpack.i.b16 %v5818_v30, %v1941_v20  ;;  %v5246_v2 = vld [vmem:[%s6721_s3 + $0x8] sm:$0xff]   ;;  %v6733_v6 = vunpack.i.h.s16 %v5861_v62 }
 0x19e   : > { %v1697_v5 = vrot.slane %v1690_v60, %v5746_v57  ;;  %v1826_v7 = vrot.slane %v1818_v15, %v5746_v57  ;;  %v5984_v52 = vpack.i.b16 %v5970_v53, %v6727_v39  ;;  %v5988_v45 = vpack.i.b16 %v5838_v32, %v5974_v17 }
 0x19f   : > { %v1833_v44 = vrot.slane %v1819_v0, %v5746_v57  ;;  %v1964_v60 = vcombine.low %v5768_v13, %v5765_v63  ;;  %v1857_v15 = vrot.slane %v1590_v4, %v5746_v57  ;;  %v1965_v0 = vcombine.low %v4561_v40, %v5923_v12 }
 0x1a0   : > { %6763 = vst [vmem:[#allocation6_spill] sm:$0xff] %v5988_v45  ;;  %v1705_v21 = vcombine.low %v1697_v5, %v1704_v58  ;;  %v5999_v46 = vrot.slane %v1835_v18, %v5746_v57  ;;  %v1966_v25 = vcombine.low %v5984_v52, %v5761_v27  ;;  %v1967_v13 = vcombine.low %v5776_v54, %v5988_v45 }
 0x1a1   : > { %v1834_v39 = vcombine.low %v1826_v7, %v1833_v44  ;;  %v1974_v58 = vrot.slane %v1964_v60, %v5746_v57  ;;  %v1981_v4 = vrot.slane %v1965_v0, %v5746_v57  ;;  %v6010_v40 = vcombine.high %v5838_v32, %v5838_v32  ;;  %v5247_v60 = vld [vmem:[%s6721_s3 + $0x20] sm:$0xff]  }
 0x1a2   : > { %6764 = vst [vmem:[#allocation7_spill] sm:$0xff] %v5999_v46  ;;  %4939 = vmatmul.mubr.msk.bf16.vlgmr.msra.gmra.mrb[4].mxu1 %vm398_vm3, %v1705_v21  ;;  %v6014_v18 = vcombine.high %v5848_v48, %v5848_v48  ;;  %v1988_v5 = vrot.slane %v1966_v25, %v5746_v57  ;;  %v1995_v21 = vrot.slane %v1967_v13, %v5746_v57  ;;  %v2123_v44 = vunpack.i.h.s16 %v1941_v20 }
 0x1a3   : > { %4943 = vmatpush3.bf16.msra.mxu1 %v5735_v41  ;;  %4946 = vmatprep.mubr.msk.bf16.mxu1 %vm398_vm3, %v1834_v39  ;;  %v2014_v7 = vcombine.low %v5848_v48, %v5852_v3  ;;  %v1858_v0 = vcombine.low %v5999_v46, %v1850_v35  ;;  %v1872_v61 = vrot.slane %v1857_v15, %v5746_v57  ;;  %v2125_v51 = vunpack.i.h.s16 %v5974_v17 }
 0x1a4   : > { %6765 = vst [vmem:[#allocation8_spill] sm:$0xff] %v6014_v18  ;;  %4944 = vmatprep.subr.bf16.mxu1 %v5246_v2  ;;  %v1996_v41 = vcombine.low %v1974_v58, %v1981_v4  ;;  %v6030_v25 = vpack.i.b16 %v6010_v40, %v6733_v6  ;;  %v1997_v39 = vcombine.low %v1988_v5, %v1995_v21  ;;  %v1950_v13 = vunpack.i.l.s16 %v6014_v18 }
 0x1a5   : > { %v4573_v26 = vpack.i.b16 %v1941_v20, %v1595_v34  ;;  %v6040_v15 = vrot.slane %v2014_v7, %v5746_v57  ;;  %v6766_v58 = vunpack.i.h.s16 %v5818_v30  ;;  %v6767_v21 = vunpack.i.h.s16 %v5776_v54 }
 0x1a6   : > { %v2004_v45 = vrot.slane %v1996_v41, %v5746_v57  ;;  %v2013_v35 = vcombine.low %v5953_v24, %v6030_v25  ;;  %v2011_v5 = vrot.slane %v1997_v39, %v5746_v57  ;;  %v6768_v63 = vunpack.i.h.s16 %v5838_v32 }
 0x1a7   : > { %v2134_v4 = vpack.i.b16 %v6766_v58, %v2123_v44  ;;  %4945 = vmatpush3.bf16.msra.mxu1 %v5246_v2  ;;  %v6048_v6 = vpack.i.b16 %v5974_v17, %v6767_v21  ;;  %v2141_v20 = vcombine.low %v5797_v56, %v4573_v26  ;;  %v1865_v7 = vrot.slane %v1858_v0, %v5746_v57 }
 0x1a8   : > { %v6052_v34 = vpack.i.b16 %v6768_v63, %v2125_v51  ;;  %4950 = vmatprep.subr.bf16.mxu1 %v5247_v60  ;;  %v6057_v41 = vrot.slane %v2013_v35, %v5746_v57  ;;  %v2143_v44 = vcombine.low %v5970_v53, %v5815_v28  ;;  %v2012_v39 = vcombine.low %v2004_v45, %v2011_v5 }
 0x1a9   : > { %v2142_v2 = vcombine.low %v2134_v4, %v5801_v31  ;;  %v2035_v58 = vrot.slane %v1950_v13, %v5746_v57  ;;  %v2151_v21 = vrot.slane %v2141_v20, %v5746_v57  ;;  %v6072_v35 = vpack.i.b16 %v6014_v18, %v5889_v1 }
 0x1aa   : > { %6769 = vst [vmem:[#allocation9_spill] sm:$0xff] %v6052_v34  ;;  %6770 = vst [vmem:[#allocation10_spill] sm:$0xff] %v6057_v41  ;;  %v2144_v51 = vcombine.low %v6048_v6, %v6052_v34  ;;  %v2036_v56 = vcombine.low %v6057_v41, %v6040_v15  ;;  %v2165_v0 = vrot.slane %v2143_v44, %v5746_v57  ;;  %v6772_v45 = vunpack.i.h.s16 %v5855_v23  ;;  %v5248_v44 = vld [vmem:[%s6721_s3 + $0x28] sm:$0xff]  }
 0x1ab   : > { %v2158_v26 = vrot.slane %v2142_v2, %v5746_v57  ;;  %6771 = vst [vmem:[#allocation11_spill] sm:$0xff] %v6072_v35  ;;  %v6773_v4 = vunpack.i.h.s16 %v5876_v33  ;;  %v4585_v20 = vpack.i.b16 %v5752_v22, %v5801_v31  ;;  %v1873_v2 = vcombine.low %v1865_v7, %v1872_v61 }
 0x1ac   : > { %v6077_v13 = vpack.i.b16 %v5876_v33, %v6772_v45  ;;  %v2172_v63 = vrot.slane %v2144_v51, %v5746_v57  ;;  %v2191_v45 = vcombine.low %v5909_v14, %v6072_v35  ;;  %v6094_v46 = vpack.i.b16 %v5828_v11, %v5861_v62 }
 0x1ad   : > { %v6082_v5 = vpack.i.b16 %v5884_v59, %v6773_v4  ;;  %v2173_v41 = vcombine.low %v2151_v21, %v2158_v26  ;;  %v2050_v4 = vrot.slane %v2035_v58, %v5746_v57  ;;  %v6744_v51 = vunpack.i.h.s16 %v6014_v18 }
 0x1ae   : > { %6774 = vst [vmem:[#allocation12_spill] sm:$0xff] %v6094_v46  ;;  %v2174_v59 = vcombine.low %v2165_v0, %v2172_v63  ;;  %v2340_v61 = vcombine.low %v5772_v49, %v5818_v30  ;;  %4947 = vmatmul.mubr.msk.bf16.vlgmr.msra.gmra.mrb[4].mxu1 %vm398_vm3, %v1873_v2  ;;  %v2043_v7 = vrot.slane %v2036_v56, %v5746_v57  ;;  %v6776_v34 = vunpack.i.h.s16 %v5752_v22 }
 0x1af   : > { %v2181_v21 = vrot.slane %v2173_v41, %v5746_v57  ;;  %v4576_v26 = vcombine.high %v5780_v42, %v5838_v32  ;;  %v2341_v35 = vcombine.low %v4585_v20, %v5810_v47  ;;  %4951 = vmatpush3.bf16.msra.mxu1 %v5247_v60  ;;  %4954 = vmatprep.mubr.msk.bf16.mxu1 %vm398_vm3, %v2012_v39  ;;  %v5249_v41 = vld [vmem:[%s6721_s3 + $0x30] sm:$0xff]   ;;  %v6778_v18 = vunpack.i.h.s16 %v5828_v11 }
 0x1b0   : > { %v2188_v58 = vrot.slane %v2174_v59, %v5746_v57  ;;  %v2342_v0 = vcombine.low %v5815_v28, %v5780_v42  ;;  %v2343_v49 = vcombine.low %v5838_v32, %v6094_v46  ;;  %4952 = vmatprep.subr.bf16.mxu1 %v5248_v44  ;;  %v6116_v56 = vrot.slane %v2191_v45, %v5746_v57 }
 0x1b1   : > { %v2350_v60 = vrot.slane %v2340_v61, %v5746_v57  ;;  %v2357_v39 = vrot.slane %v2341_v35, %v5746_v57  ;;  %v2389_v59 = vcombine.low %v5867_v43, %v5892_v29  ;;  %v6125_v20 = vrot.slane %v6744_v51, %v5746_v57 }
 0x1b2   : > { %v2189_v63 = vcombine.low %v2181_v21, %v2188_v58  ;;  %v2364_v2 = vrot.slane %v2342_v0, %v5746_v57  ;;  %v2371_v46 = vrot.slane %v2343_v49, %v5746_v57  ;;  %v2198_v45 = vrot.slane %v4576_v26, %v5746_v57 }
 0x1b3   : > { %v2372_v42 = vcombine.low %v2350_v60, %v2357_v39  ;;  %v2327_v61 = vunpack.i.l.s16 %v5899_v36  ;;  %v6775_v35 = vunpack.i.h.s16 %v5801_v31  ;;  %4953 = vmatpush3.bf16.msra.mxu1 %v5248_v44  ;;  %v2051_v21 = vcombine.low %v2043_v7, %v2050_v4 }
 0x1b4   : > { %v2373_v58 = vcombine.low %v2364_v2, %v2371_v46  ;;  %v6777_v51 = vunpack.i.h.s16 %v5861_v62  ;;  %v2502_v26 = vcombine.low %v5914_v10, %v5923_v12  ;;  %4958 = vmatprep.subr.bf16.mxu1 %v5249_v41  ;;  %v2213_v49 = vcombine.low %v2198_v45, %v6116_v56 }
 0x1b5   : > { %v2497_v50 = vpack.i.b16 %v6776_v34, %v6775_v35  ;;  %v2380_v60 = vrot.slane %v2372_v42, %v5746_v57  ;;  %v2396_v39 = vrot.slane %v2389_v59, %v5746_v57  ;;  %v2504_v44 = vcombine.low %v5776_v54, %v5880_v55  ;;  %v5250_v35 = vld [vmem:[%s6721_s3 + $0x38] sm:$0xff]  }
 0x1b6   : > { %v6139_v0 = vpack.i.b16 %v6778_v18, %v6777_v51  ;;  %v2387_v46 = vrot.slane %v2373_v58, %v5746_v57  ;;  %v2512_v4 = vrot.slane %v2502_v26, %v5746_v57  ;;  %v2403_v10 = vrot.slane %v2327_v61, %v5746_v57 }
 0x1b7   : > { %v2503_v34 = vcombine.low %v2497_v50, %v5761_v27  ;;  %v6748_v42 = vunpack.i.h.s16 %v5867_v43  ;;  %v6747_v7 = vunpack.i.h.s16 %v5892_v29  ;;  %v2404_v50 = vcombine.low %v5947_v9, %v2396_v39 }
 0x1b8   : > { %6779 = vst [vmem:[#allocation13_spill] sm:$0xff] %v6139_v0  ;;  %v2505_v18 = vcombine.low %v5953_v24, %v6139_v0  ;;  %v6157_v59 = vcombine.low %v2380_v60, %v2387_v46  ;;  %v2526_v2 = vrot.slane %v2504_v44, %v5746_v57  ;;  %v6166_v61 = vunpack.i.h.s16 %v5899_v36 }
 0x1b9   : > { %v2519_v51 = vrot.slane %v2503_v34, %v5746_v57  ;;  %v6171_v26 = vpack.i.b16 %v5892_v29, %v6748_v42  ;;  %v6176_v9 = vpack.i.b16 %v5899_v36, %v6747_v7  ;;  %v2227_v60 = vrot.slane %v6125_v20, %v5746_v57 }
 0x1ba   : > { %v2533_v45 = vrot.slane %v2505_v18, %v5746_v57  ;;  %v4605_v34 = vpack.i.b16 %v5761_v27, %v5970_v53  ;;  %v6184_v46 = vpack.i.b16 %v5848_v48, %v6010_v40  ;;  %4955 = vmatmul.mubr.msk.bf16.vlgmr.msra.gmra.mrb[4].mxu1 %vm398_vm3, %v2051_v21  ;;  %v2220_v44 = vrot.slane %v2213_v49, %v5746_v57 }
 0x1bb   : > { %v2534_v58 = vcombine.low %v2512_v4, %v2519_v51  ;;  %6780 = vst [vmem:[#allocation14_spill] sm:$0xff] %v6171_v26  ;;  %v2418_v18 = vrot.slane %v2403_v10, %v5746_v57  ;;  %v2551_v4 = vcombine.low %v6171_v26, %v6176_v9  ;;  %v2664_v20 = vcombine.low %v5818_v30, %v5801_v31  ;;  %v5251_v10 = vld [vmem:[%s6721_s3 + $0x40] sm:$0xff]  }
 0x1bc   : > { %v2535_v39 = vcombine.low %v2526_v2, %v2533_v45  ;;  %6781 = vst [vmem:[#allocation15_spill] sm:$0xff] %v6184_v46  ;;  %4959 = vmatpush3.bf16.msra.mxu1 %v5249_v41  ;;  %4962 = vmatprep.mubr.msk.bf16.mxu1 %vm398_vm3, %v2189_v63  ;;  %v2665_v21 = vcombine.low %v4605_v34, %v5815_v28  ;;  %v2124_v49 = vunpack.i.h.s16 %v5970_v53  ;;  %v6782_v7 = vunpack.i.h.s16 %v5761_v27 }
 0x1bd   : > { %v6195_v51 = vrot.slane %v2534_v58, %v5746_v57  ;;  %4960 = vmatprep.subr.bf16.mxu1 %v5250_v35  ;;  %v2411_v31 = vrot.slane %v2404_v50, %v5746_v57  ;;  %v6207_v30 = vrot.slane %v2551_v4, %v5746_v57  ;;  %v2565_v41 = vrot.slane %v6166_v61, %v5746_v57 }
 0x1be   : > { %v6198_v2 = vrot.slane %v2535_v39, %v5746_v57  ;;  %v2667_v63 = vcombine.low %v5861_v62, %v6184_v46  ;;  %v2666_v53 = vcombine.low %v6048_v6, %v5838_v32  ;;  %v2674_v58 = vrot.slane %v2664_v20, %v5746_v57 }
 0x1bf   : > { %v2681_v39 = vrot.slane %v2665_v21, %v5746_v57  ;;  %v6221_v50 = vcombine.high %v5892_v29, %v5892_v29  ;;  %v2713_v34 = vcombine.low %v5892_v29, %v5899_v36  ;;  %v2126_v4 = vunpack.i.h.s16 %v6010_v40 }
 0x1c0   : > { %v2821_v42 = vpack.i.b16 %v6782_v7, %v2124_v49  ;;  %4961 = vmatpush3.bf16.msra.mxu1 %v5250_v35  ;;  %v2566_v45 = vcombine.low %v6040_v15, %v6207_v30  ;;  %v6231_v20 = vrot.slane %v2667_v63, %v5746_v57  ;;  %v2827_v46 = vcombine.low %v5923_v12, %v5984_v52 }
 0x1c1   : > { %v6233_v21 = vcombine.low %v2674_v58, %v2681_v39  ;;  %v6783_v26 = vcombine.low %v5855_v23, %v5876_v33  ;;  %4966 = vmatprep.subr.bf16.mxu1 %v5251_v10  ;;  %v6784_v15 = vunpack.i.h.s16 %v5848_v48  ;;  %v2228_v63 = vcombine.low %v2220_v44, %v2227_v60 }
 0x1c2   : > { %v2828_v49 = vcombine.low %v2821_v42, %v5776_v54  ;;  %v6250_v58 = vcombine.low %v2411_v31, %v2418_v18  ;;  %v2688_v12 = vrot.slane %v2666_v53, %v5746_v57  ;;  %v2829_v23 = vcombine.low %v5974_v17, %v5953_v24  ;;  %v5252_v18 = vld [vmem:[%s6721_s3 + $0x48] sm:$0xff]  }
 0x1c3   : > { %v6241_v0 = vrot.slane %v6783_v26, %v5746_v57  ;;  %v6247_v35 = vpack.i.b16 %v6784_v15, %v2126_v4  ;;  %v6256_v52 = vrot.slane %v2565_v41, %v5746_v57  ;;  %v2654_v26 = vunpack.i.l.s16 %v6221_v50 }
 0x1c4   : > { %v6260_v39 = vrot.slane %v2713_v34, %v5746_v57  ;;  %v6265_v42 = vrot.slane %v2566_v45, %v5746_v57  ;;  %v2697_v60 = vcombine.low %v2688_v12, %v6231_v20  ;;  %v2837_v44 = vrot.slane %v2827_v46, %v5746_v57 }
 0x1c5   : > { %v2830_v4 = vcombine.low %v6030_v25, %v6247_v35  ;;  %v2844_v17 = vrot.slane %v2828_v49, %v5746_v57  ;;  %v2851_v31 = vrot.slane %v2829_v23, %v5746_v57  ;;  %v6752_v53 = vunpack.i.h.s16 %v6221_v50 }
 0x1c6   : > { %v6278_v45 = vpack.i.b16 %v6221_v50, %v6166_v61  ;;  %v2704_v34 = vrot.slane %v6233_v21, %v5746_v57  ;;  %v4616_v20 = vcombine.high %v5828_v11, %v5848_v48  ;;  %v4625_v15 = vpack.i.b16 %v5867_v43, %v5852_v3  ;;  %4963 = vmatmul.mubr.msk.bf16.vlgmr.msra.gmra.mrb[4].mxu1 %vm398_vm3, %v2228_v63 }
 0x1c7   : > { %v2858_v41 = vrot.slane %v2830_v4, %v5746_v57  ;;  %v2859_v46 = vcombine.low %v2837_v44, %v2844_v17  ;;  %v6288_v49 = vrot.slane %v2654_v26, %v5746_v57  ;;  %v3023_v4 = vcombine.low %v5752_v22, %v5761_v27  ;;  %4967 = vmatpush3.bf16.msra.mxu1 %v5251_v10  ;;  %v5253_v22 = vld [vmem:[%s6721_s3 + $0x50] sm:$0xff]  }
 0x1c8   : > { %v2877_v23 = vcombine.low %v6176_v9, %v6278_v45  ;;  %v6754_v21 = vunpack.i.h.s16 %v5843_v38  ;;  %4970 = vmatprep.mubr.msk.bf16.mxu1 %vm398_vm3, %v6157_v59  ;;  %v2898_v63 = vrot.slane %v6752_v53, %v5746_v57  ;;  %v3024_v26 = vcombine.low %v5927_v19, %v5880_v55  ;;  %4968 = vmatprep.subr.bf16.mxu1 %v5252_v18 }
 0x1c9   : > { %v2860_v12 = vcombine.low %v2851_v31, %v2858_v41  ;;  %v6298_v44 = vrot.slane %v2859_v46, %v5746_v57  ;;  %v2884_v59 = vrot.slane %v4616_v20, %v5746_v57  ;;  %v3025_v31 = vcombine.low %v5953_v24, %v5828_v11 }
 0x1ca   : > { %v6313_v17 = vrot.slane %v2877_v23, %v5746_v57  ;;  %v3026_v41 = vcombine.low %v5848_v48, %v4625_v15  ;;  %v3033_v55 = vrot.slane %v3023_v4, %v5746_v57  ;;  %v3040_v19 = vrot.slane %v3024_v26, %v5746_v57 }
 0x1cb   : > { %v6309_v10 = vrot.slane %v2860_v12, %v5746_v57  ;;  %v3072_v46 = vcombine.low %v5843_v38, %v5864_v16  ;;  %v2728_v12 = vcombine.low %v6116_v56, %v6260_v39  ;;  %v3047_v53 = vrot.slane %v3025_v31, %v5746_v57  ;;  %4969 = vmatpush3.bf16.msra.mxu1 %v5252_v18 }
 0x1cc   : > { %v2899_v23 = vcombine.low %v2884_v59, %v6313_v17  ;;  %v3054_v11 = vrot.slane %v3026_v41, %v5746_v57  ;;  %v3055_v15 = vcombine.low %v3033_v55, %v3040_v19  ;;  %v6785_v26 = vunpack.i.h.s16 %v5867_v43  ;;  %4974 = vmatprep.subr.bf16.mxu1 %v5253_v22 }
 0x1cd   : > { %v6330_v4 = vrot.slane %v3072_v46, %v5746_v57  ;;  %v2913_v20 = vrot.slane %v2898_v63, %v5746_v57  ;;  %v3184_v59 = vcombine.low %v5810_v47, %v5815_v28  ;;  %v3185_v18 = vcombine.low %v5824_v8, %v5838_v32 }
 0x1ce   : > { %v3180_v7 = vpack.i.b16 %v6785_v26, %v5889_v1  ;;  %v2906_v56 = vrot.slane %v2899_v23, %v5746_v57  ;;  %v2711_v31 = vrot.slane %v2697_v60, %v5746_v57  ;;  %v3056_v41 = vcombine.low %v3047_v53, %v3054_v11 }
 0x1cf   : > { %v3186_v1 = vcombine.low %v5861_v62, %v5904_v37  ;;  %v3194_v63 = vrot.slane %v3184_v59, %v5746_v57  ;;  %v3201_v47 = vrot.slane %v3185_v18, %v5746_v57  ;;  %v2581_v8 = vcombine.low %v6265_v42, %v6256_v52  ;;  %v6786_v18 = vld [vmem:[#allocation3_spill] sm:$0xff]  ;;  %v6795_v52 = vld [vmem:[#allocation12_spill] sm:$0xff] }
 0x1d0   : > { %v6346_v19 = vcombine.low %v2906_v56, %v2913_v20  ;;  %v3187_v46 = vcombine.low %v5909_v14, %v3180_v7  ;;  %v3063_v60 = vrot.slane %v3055_v15, %v5746_v57  ;;  %v3070_v53 = vrot.slane %v3056_v41, %v5746_v57  ;;  %v5254_v20 = vld [vmem:[%s6721_s3 + $0x58] sm:$0xff]  }
 0x1d1   : > { %v6753_v23 = vunpack.i.h.s16 %v5864_v16  ;;  %v2735_v11 = vrot.slane %v2728_v12, %v5746_v57  ;;  %v3208_v7 = vrot.slane %v3186_v1, %v5746_v57  ;;  %v3216_v56 = vcombine.low %v3194_v63, %v3201_v47  ;;  %v6787_v63 = vld [vmem:[#allocation8_spill] sm:$0xff] }
 0x1d2   : > { %v3215_v26 = vrot.slane %v3187_v46, %v5746_v57  ;;  %v6362_v59 = vcombine.low %v3063_v60, %v3070_v53  ;;  %v4634_v15 = vpack.i.b16 %v5864_v16, %v6754_v21  ;;  %v3335_v55 = vcombine.high %v5864_v16, %v5864_v16  ;;  %4971 = vmatmul.mubr.msk.bf16.vlgmr.msra.gmra.mrb[4].mxu1 %vm398_vm3, %v6250_v58 }
 0x1d3   : > { %v6370_v41 = vpack.i.b16 %v6786_v18, %v6753_v23  ;;  %v2712_v12 = vcombine.low %v2704_v34, %v2711_v31  ;;  %v2742_v1 = vrot.slane %v6288_v49, %v5746_v57  ;;  %v4644_v47 = vpack.i.b16 %v5892_v29, %v6787_v63  ;;  %4975 = vmatpush3.bf16.msra.mxu1 %v5253_v22  ;;  %v5255_v49 = vld [vmem:[%s6721_s3 + $0x60] sm:$0xff]  }
 0x1d4   : > { %v3217_v46 = vcombine.low %v3208_v7, %v3215_v26  ;;  %v6788_v60 = vcombine.low %v6195_v51, %v6198_v2  ;;  %v3174_v53 = vunpack.i.h.s16 %v6786_v18  ;;  %v3345_v58 = vcombine.low %v5761_v27, %v5776_v54  ;;  %4976 = vmatprep.subr.bf16.mxu1 %v5254_v20  ;;  %v6789_v2 = vld [vmem:[#allocation6_spill] sm:$0xff] }
 0x1d5   : > { %v3233_v23 = vcombine.low %v4634_v15, %v6370_v41  ;;  %v3336_v34 = vunpack.i.l.s16 %v3335_v55  ;;  %v6392_v22 = vrot.slane %v3216_v56, %v5746_v57  ;;  %v3346_v31 = vcombine.low %v6789_v2, %v5953_v24 }
 0x1d6   : > { %4978 = vmatprep.mubr.msk.bf16.mxu1 %vm398_vm3, %v6788_v60  ;;  %v6395_v51 = vrot.slane %v3217_v46, %v5746_v57  ;;  %v3347_v7 = vcombine.low %v6030_v25, %v5848_v48  ;;  %v3348_v54 = vcombine.low %v5852_v3, %v4644_v47  ;;  %v3355_v26 = vrot.slane %v3345_v58, %v5746_v57 }
 0x1d7   : > { %v6402_v27 = vrot.slane %v3233_v23, %v5746_v57  ;;  %v3394_v56 = vcombine.low %v5864_v16, %v6786_v18  ;;  %v3362_v46 = vrot.slane %v3346_v31, %v5746_v57  ;;  %v3408_v60 = vrot.slane %v3336_v34, %v5746_v57  ;;  %4977 = vmatpush3.bf16.msra.mxu1 %v5254_v20  ;;  %v6792_v34 = vld [vmem:[#allocation9_spill] sm:$0xff] }
 0x1d8   : > { %v3369_v24 = vrot.slane %v3347_v7, %v5746_v57  ;;  %v3376_v23 = vrot.slane %v3348_v54, %v5746_v57  ;;  %v6790_v58 = vunpack.i.h.s16 %v6787_v63  ;;  %v6791_v2 = vunpack.i.h.s16 %v5892_v29  ;;  %4982 = vmatprep.subr.bf16.mxu1 %v5255_v49 }
 0x1d9   : > { %v6417_v47 = vrot.slane %v3394_v56, %v5746_v57  ;;  %v6423_v31 = vcombine.low %v2735_v11, %v2742_v1  ;;  %v3377_v7 = vcombine.low %v3355_v26, %v3362_v46  ;;  %v3506_v20 = vcombine.low %v5815_v28, %v6048_v6  ;;  %v6793_v1 = vld [vmem:[#allocation11_spill] sm:$0xff] }
 0x1da   : > { %v3502_v15 = vpack.i.b16 %v6791_v2, %v6790_v58  ;;  %v3507_v25 = vcombine.low %v6792_v34, %v5861_v62  ;;  %v4653_v54 = vpack.i.b16 %v3335_v55, %v3174_v53  ;;  %v3378_v56 = vcombine.low %v3369_v24, %v3376_v23 }
 0x1db   : > { %v3409_v21 = vcombine.low %v6313_v17, %v6417_v47  ;;  %v3508_v58 = vcombine.low %v6010_v40, %v5909_v14  ;;  %v3423_v11 = vrot.slane %v3408_v60, %v5746_v57  ;;  %v3516_v46 = vrot.slane %v3506_v20, %v5746_v57  ;;  %v5256_v40 = vld [vmem:[%s6721_s3 + $0x68] sm:$0xff]  }
 0x1dc   : > { %v3509_v26 = vcombine.low %v6793_v1, %v3502_v15  ;;  %v3523_v28 = vrot.slane %v3507_v25, %v5746_v57  ;;  %v3385_v62 = vrot.slane %v3377_v7, %v5746_v57  ;;  %v3392_v6 = vrot.slane %v3378_v56, %v5746_v57 }
 0x1dd   : > { %v3416_v24 = vrot.slane %v3409_v21, %v5746_v57  ;;  %v3530_v23 = vrot.slane %v3508_v58, %v5746_v57  ;;  %v3496_v15 = vunpack.i.h.s16 %v3335_v55  ;;  %v4654_v2 = vcombine.high %v5867_v43, %v5892_v29 }
 0x1de   : > { %v3537_v17 = vrot.slane %v3509_v26, %v5746_v57  ;;  %v3538_v60 = vcombine.low %v3516_v46, %v3523_v28  ;;  %v6449_v25 = vcombine.low %v3385_v62, %v3392_v6  ;;  %v3556_v20 = vcombine.low %v6370_v41, %v4653_v54  ;;  %4979 = vmatmul.mubr.msk.bf16.vlgmr.msra.gmra.mrb[4].mxu1 %vm398_vm3, %v2581_v8  ;;  %v6794_v54 = vld [vmem:[#allocation2_spill] sm:$0xff]  ;;  %v6796_v8 = vld [vmem:[#allocation4_spill] sm:$0xff] }
 0x1df   : > { %v6451_v7 = vcombine.low %v3416_v24, %v3423_v11  ;;  %v4663_v21 = vpack.i.b16 %v5843_v38, %v5899_v36  ;;  %v3563_v56 = vrot.slane %v4654_v2, %v5746_v57  ;;  %v3577_v58 = vrot.slane %v3496_v15, %v5746_v57  ;;  %4983 = vmatpush3.bf16.msra.mxu1 %v5255_v49  ;;  %v5257_v46 = vld [vmem:[%s6721_s3 + $0x70] sm:$0xff]  }
 0x1e0   : > { %v3539_v34 = vcombine.low %v3530_v23, %v3537_v17  ;;  %v6461_v55 = vrot.slane %v3538_v60, %v5746_v57  ;;  %4986 = vmatprep.mubr.msk.bf16.mxu1 %vm398_vm3, %v2712_v12  ;;  %v6467_v41 = vrot.slane %v3556_v20, %v5746_v57  ;;  %v3702_v11 = vcombine.low %v6794_v54, %v5838_v32  ;;  %v6798_v54 = vld [vmem:[#allocation13_spill] sm:$0xff] }
 0x1e1   : > { %v3703_v42 = vcombine.low %v6795_v52, %v5904_v37  ;;  %v3692_v26 = vunpack.i.l.s16 %v6796_v8  ;;  %4984 = vmatprep.subr.bf16.mxu1 %v5256_v40  ;;  %v3592_v12 = vrot.slane %v3577_v58, %v5746_v57  ;;  %v3704_v28 = vcombine.low %v5909_v14, %v5867_v43  ;;  %v6799_v52 = vld [vmem:[#allocation14_spill] sm:$0xff] }
 0x1e2   : > { %v6478_v49 = vrot.slane %v3539_v34, %v5746_v57  ;;  %v3705_v32 = vcombine.low %v5892_v29, %v4663_v21  ;;  %v3578_v62 = vcombine.low %v3563_v56, %v6467_v41  ;;  %v3712_v37 = vrot.slane %v3702_v11, %v5746_v57 }
 0x1e3   : > { %v3719_v6 = vrot.slane %v3703_v42, %v5746_v57  ;;  %v3765_v24 = vrot.slane %v3692_v26, %v5746_v57  ;;  %v3726_v17 = vrot.slane %v3704_v28, %v5746_v57  ;;  %v3766_v43 = vcombine.low %v6402_v27, %v6241_v0  ;;  %4985 = vmatpush3.bf16.msra.mxu1 %v5256_v40 }
 0x1e4   : > { %v3554_v23 = vcombine.low %v6461_v55, %v6478_v49  ;;  %v3733_v60 = vrot.slane %v3705_v32, %v5746_v57  ;;  %v3585_v15 = vrot.slane %v3578_v62, %v5746_v57  ;;  %v6797_v21 = vunpack.i.h.s16 %v5843_v38  ;;  %4990 = vmatprep.subr.bf16.mxu1 %v5257_v46  ;;  %v5272_v55 = vld [vmem:[%s6721_s3 + $0xe8] sm:$0xff]   ;;  %v5273_v49 = vld [vmem:[%s6721_s3 + $0xf0] sm:$0xff]  }
 0x1e5   : > { %v3734_v2 = vcombine.low %v3712_v37, %v3719_v6  ;;  %v3780_v20 = vrot.slane %v3765_v24, %v5746_v57  ;;  %v3773_v58 = vrot.slane %v3766_v43, %v5746_v57  ;;  %v3863_v11 = vcombine.low %v6798_v54, %v5848_v48 }
 0x1e6   : > { %v3859_v34 = vpack.i.b16 %v6797_v21, %v6166_v61  ;;  %v3735_v56 = vcombine.low %v3726_v17, %v3733_v60  ;;  %v3864_v0 = vcombine.low %v5852_v3, %v6799_v52  ;;  %v6504_v40 = vcombine.low %v3585_v15, %v3592_v12  ;;  %v5258_v60 = vld [vmem:[%s6721_s3 + $0x78] sm:$0xff]   ;;  %v6801_v15 = vld [vmem:[#allocation7_spill] sm:$0xff] }
 0x1e7   : > { %v3742_v42 = vrot.slane %v3734_v2, %v5746_v57  ;;  %v3853_v28 = vunpack.i.h.s16 %v6796_v8  ;;  %v6510_v32 = vcombine.low %v3773_v58, %v3780_v20  ;;  %v3872_v62 = vrot.slane %v3863_v11, %v5746_v57  ;;  %v6802_v21 = vld [vmem:[#allocation15_spill] sm:$0xff] }
 0x1e8   : > { %v3865_v26 = vcombine.low %v6176_v9, %v3859_v34  ;;  %v3749_v61 = vrot.slane %v3735_v56, %v5746_v57  ;;  %v3879_v37 = vrot.slane %v3864_v0, %v5746_v57  ;;  %v6800_v12 = vcombine.low %v6077_v13, %v6082_v5 }
 0x1e9   : > { %v3918_v24 = vrot.slane %v3853_v28, %v5746_v57  ;;  %v4006_v17 = vcombine.high %v5876_v33, %v5876_v33  ;;  %v3887_v2 = vcombine.low %v6801_v15, %v3872_v62  ;;  %v4682_v20 = vpack.i.b16 %v5864_v16, %v6221_v50 }
 0x1ea   : > { %v3886_v48 = vrot.slane %v3865_v26, %v5746_v57  ;;  %v3911_v6 = vrot.slane %v6800_v12, %v5746_v57  ;;  %v6525_v43 = vcombine.low %v3742_v42, %v3749_v61  ;;  %v4016_v13 = vcombine.low %v6802_v21, %v5909_v14  ;;  %4987 = vmatmul.mubr.msk.bf16.vlgmr.msra.gmra.mrb[4].mxu1 %vm398_vm3, %v6423_v31 }
 0x1eb   : > { %v3933_v58 = vrot.slane %v3918_v24, %v5746_v57  ;;  %v4691_v54 = vpack.i.b16 %v4006_v17, %v3853_v28  ;;  %v6537_v11 = vrot.slane %v3887_v2, %v5746_v57  ;;  %v4017_v52 = vcombine.low %v6793_v1, %v5892_v29  ;;  %4991 = vmatpush3.bf16.msra.mxu1 %v5257_v46  ;;  %v5259_v29 = vld [vmem:[%s6721_s3 + $0x80] sm:$0xff]  }
 0x1ec   : > { %v3888_v34 = vcombine.low %v3879_v37, %v3886_v48  ;;  %v3919_v56 = vcombine.low %v6417_v47, %v3911_v6  ;;  %v4018_v0 = vcombine.low %v5899_v36, %v4682_v20  ;;  %v4025_v42 = vrot.slane %v4016_v13, %v5746_v57  ;;  %4992 = vmatprep.subr.bf16.mxu1 %v5258_v60 }
 0x1ed   : > { %v6803_v14 = vcombine.low %v6298_v44, %v6309_v10  ;;  %v4007_v26 = vunpack.i.l.s16 %v4006_v17  ;;  %v4057_v28 = vcombine.low %v5876_v33, %v6796_v8  ;;  %v4032_v36 = vrot.slane %v4017_v52, %v5746_v57  ;;  %v6804_v10 = vld [vmem:[#allocation5_spill] sm:$0xff] }
 0x1ee   : > { %v6548_v47 = vrot.slane %v3888_v34, %v5746_v57  ;;  %v3926_v31 = vrot.slane %v3919_v56, %v5746_v57  ;;  %v4039_v44 = vrot.slane %v4018_v0, %v5746_v57  ;;  %v4040_v1 = vcombine.low %v6804_v10, %v4025_v42 }
 0x1ef   : > { %4994 = vmatprep.mubr.msk.bf16.mxu1 %vm398_vm3, %v6803_v14  ;;  %v6805_v46 = vunpack.i.h.s16 %v6221_v50  ;;  %v6806_v61 = vunpack.i.h.s16 %v5864_v16  ;;  %v4064_v8 = vrot.slane %v4057_v28, %v5746_v57  ;;  %v4071_v48 = vrot.slane %v4007_v26, %v5746_v57  ;;  %4993 = vmatpush3.bf16.msra.mxu1 %v5258_v60 }
 0x1f0   : > { %v3903_v37 = vcombine.low %v6537_v11, %v6548_v47  ;;  %v6565_v33 = vcombine.low %v3926_v31, %v3933_v58  ;;  %v4041_v12 = vcombine.low %v4032_v36, %v4039_v44  ;;  %v4169_v6 = vcombine.low %v6247_v35, %v5852_v3  ;;  %4998 = vmatprep.subr.bf16.mxu1 %v5259_v29  ;;  %v5261_v36 = vld [vmem:[%s6721_s3 + $0x90] sm:$0xff]  }
 0x1f1   : > { %v4165_v62 = vpack.i.b16 %v6806_v61, %v6805_v46  ;;  %v4170_v24 = vcombine.low %v6787_v63, %v6176_v9  ;;  %v4048_v50 = vrot.slane %v4040_v1, %v5746_v57  ;;  %v4072_v15 = vcombine.low %v6467_v41, %v4064_v8  ;;  %v5262_v46 = vld [vmem:[%s6721_s3 + $0x98] sm:$0xff]  }
 0x1f2   : > { %v4159_v20 = vunpack.i.h.s16 %v4006_v17  ;;  %v4055_v21 = vrot.slane %v4041_v12, %v5746_v57  ;;  %v4086_v13 = vrot.slane %v4071_v48, %v5746_v57  ;;  %v4178_v34 = vrot.slane %v4169_v6, %v5746_v57  ;;  %v6807_v17 = vld [vmem:[#allocation10_spill] sm:$0xff]  ;;  %v5264_v48 = vld [vmem:[%s6721_s3 + $0xa8] sm:$0xff]  }
 0x1f3   : > { %v4171_v2 = vcombine.low %v6278_v45, %v4165_v62  ;;  %v4692_v3 = vcombine.high %v5843_v38, %v5864_v16  ;;  %v4079_v9 = vrot.slane %v4072_v15, %v5746_v57  ;;  %v4185_v35 = vrot.slane %v4170_v24, %v5746_v57  ;;  %v5260_v16 = vld [vmem:[%s6721_s3 + $0x88] sm:$0xff]  }
 0x1f4   : > { %v4211_v41 = vcombine.low %v6082_v5, %v4691_v54  ;;  %v6585_v45 = vcombine.low %v4048_v50, %v4055_v21  ;;  %v4193_v60 = vcombine.low %v6807_v17, %v4178_v34  ;;  %v4232_v56 = vrot.slane %v4159_v20, %v5746_v57 }
 0x1f5   : > { %v4192_v63 = vrot.slane %v4171_v2, %v5746_v57  ;;  %v6589_v58 = vcombine.low %v4079_v9, %v4086_v13  ;;  %v4218_v0 = vrot.slane %v4692_v3, %v5746_v57  ;;  %v3013_v14 = vunpack.i.l.s16 %v6786_v18  ;;  %v5265_v18 = vld [vmem:[%s6721_s3 + $0xb0] sm:$0xff]  }
 0x1f6   : > { %v4225_v38 = vrot.slane %v4211_v41, %v5746_v57  ;;  %v6597_v42 = vrot.slane %v4193_v60, %v5746_v57  ;;  %4995 = vmatmul.mubr.msk.bf16.vlgmr.msra.gmra.mrb[4].mxu1 %vm398_vm3, %v6346_v19  ;;  %v4247_v28 = vrot.slane %v4232_v56, %v5746_v57  ;;  %v6809_v61 = vcombine.low %v6392_v22, %v6395_v51 }
 0x1f7   : > { %v4194_v52 = vcombine.low %v4185_v35, %v4192_v63  ;;  %4999 = vmatpush3.bf16.msra.mxu1 %v5259_v29  ;;  %5002 = vmatprep.mubr.msk.bf16.mxu1 %vm398_vm3, %v6362_v59  ;;  %v3086_v19 = vrot.slane %v3013_v14, %v5746_v57  ;;  %v6808_v59 = vcombine.low %v6207_v30, %v6330_v4  ;;  %v5263_v30 = vld [vmem:[%s6721_s3 + $0xa0] sm:$0xff]  }
 0x1f8   : > { %v4233_v54 = vcombine.low %v4218_v0, %v4225_v38  ;;  %5000 = vmatprep.subr.bf16.mxu1 %v5260_v16  ;;  %v3247_v4 = vrot.slane %v3174_v53, %v5746_v57  ;;  %v6810_v62 = vcombine.low %v6260_v39, %v6402_v27  ;;  %v5267_v39 = vld [vmem:[%s6721_s3 + $0xc0] sm:$0xff]   ;;  %v5268_v53 = vld [vmem:[%s6721_s3 + $0xc8] sm:$0xff]   ;;  %v5269_v27 = vld [vmem:[%s6721_s3 + $0xd0] sm:$0xff]  }
 0x1f9   : > { %v6600_v5 = vrot.slane %v4194_v52, %v5746_v57  ;;  %v3094_v29 = vrot.slane %v6808_v59, %v5746_v57  ;;  %v3101_v10 = vrot.slane %v3086_v19, %v5746_v57 }
 0x1fa   : > { %v4240_v26 = vrot.slane %v4233_v54, %v5746_v57  ;;  %v3255_v8 = vrot.slane %v6810_v62, %v5746_v57  ;;  %v3262_v22 = vrot.slane %v3247_v4, %v5746_v57  ;;  %v5266_v57 = vld [vmem:[%s6721_s3 + $0xb8] sm:$0xff]  }
 0x1fb   : > { %v4209_v31 = vcombine.low %v6597_v42, %v6600_v5  ;;  %5001 = vmatpush3.bf16.msra.mxu1 %v5260_v16  ;;  %v3102_v1 = vcombine.low %v3094_v29, %v3101_v10 }
 0x1fc   : > { %v6614_v44 = vcombine.low %v4240_v26, %v4247_v28  ;;  %5006 = vmatprep.subr.bf16.mxu1 %v5261_v36  ;;  %v3263_v51 = vcombine.low %v3255_v8, %v3262_v22 }
 0x202   : > { %5003 = vmatmul.mubr.msk.bf16.vlgmr.msra.gmra.mrb[4].mxu1 %vm398_vm3, %v3102_v1 }
 0x203   : > { %5007 = vmatpush3.bf16.msra.mxu1 %v5261_v36  ;;  %5010 = vmatprep.mubr.msk.bf16.mxu1 %vm398_vm3, %v6809_v61 }
 0x204   : > { %5008 = vmatprep.subr.bf16.mxu1 %v5262_v46 }
 0x207   : > { %5009 = vmatpush3.bf16.msra.mxu1 %v5262_v46 }
 0x208   : > { %5014 = vmatprep.subr.bf16.mxu1 %v5263_v30 }
 0x20e   : > { %5011 = vmatmul.mubr.msk.bf16.vlgmr.msra.gmra.mrb[4].mxu1 %vm398_vm3, %v3263_v51 }
 0x20f   : > { %5015 = vmatpush3.bf16.msra.mxu1 %v5263_v30  ;;  %5018 = vmatprep.mubr.msk.bf16.mxu1 %vm398_vm3, %v6449_v25  ;;  %v5270_v25 = vld [vmem:[%s6721_s3 + $0xd8] sm:$0xff]  }
 0x210   : > { %5016 = vmatprep.subr.bf16.mxu1 %v5264_v48 }
 0x213   : > { %5017 = vmatpush3.bf16.msra.mxu1 %v5264_v48 }
 0x214   : > { %5022 = vmatprep.subr.bf16.mxu1 %v5265_v18 }
 0x21a   : > { %5019 = vmatmul.mubr.msk.bf16.vlgmr.msra.gmra.mrb[4].mxu1 %vm398_vm3, %v6451_v7  ;;  %v5271_v7 = vld [vmem:[%s6721_s3 + $0xe0] sm:$0xff]  }
 0x21b   : > { %5023 = vmatpush3.bf16.msra.mxu1 %v5265_v18  ;;  %5026 = vmatprep.mubr.msk.bf16.mxu1 %vm398_vm3, %v3554_v23  ;;  %v5274_v23 = vld [vmem:[%s6721_s3 + $0xf8] sm:$0xff]  }
 0x21c   : > { %5024 = vmatprep.subr.bf16.mxu1 %v5266_v57 }
 0x21f   : > { %5025 = vmatpush3.bf16.msra.mxu1 %v5266_v57 }
 0x220   : > { %5030 = vmatprep.subr.bf16.mxu1 %v5267_v39 }
 0x226   : > { %5027 = vmatmul.mubr.msk.bf16.vlgmr.msra.gmra.mrb[4].mxu1 %vm398_vm3, %v6504_v40 }
 0x227   : > { %5031 = vmatpush3.bf16.msra.mxu1 %v5267_v39  ;;  %5034 = vmatprep.mubr.msk.bf16.mxu1 %vm398_vm3, %v6525_v43 }
 0x228   : > { %5032 = vmatprep.subr.bf16.mxu1 %v5268_v53 }
 0x22b   : > { %5033 = vmatpush3.bf16.msra.mxu1 %v5268_v53 }
 0x22c   : > { %5038 = vmatprep.subr.bf16.mxu1 %v5269_v27 }
 0x232   : > { %5035 = vmatmul.mubr.msk.bf16.vlgmr.msra.gmra.mrb[4].mxu1 %vm398_vm3, %v6510_v32 }
 0x233   : > { %5039 = vmatpush3.bf16.msra.mxu1 %v5269_v27  ;;  %5042 = vmatprep.mubr.msk.bf16.mxu1 %vm398_vm3, %v3903_v37 }
 0x234   : > { %5040 = vmatprep.subr.bf16.mxu1 %v5270_v25 }
 0x237   : > { %5041 = vmatpush3.bf16.msra.mxu1 %v5270_v25 }
 0x238   : > { %5046 = vmatprep.subr.bf16.mxu1 %v5271_v7 }
 0x23e   : > { %5043 = vmatmul.mubr.msk.bf16.vlgmr.msra.gmra.mrb[4].mxu1 %vm398_vm3, %v6565_v33 }
 0x23f   : > { %5047 = vmatpush3.bf16.msra.mxu1 %v5271_v7  ;;  %5050 = vmatprep.mubr.msk.bf16.mxu1 %vm398_vm3, %v6585_v45 }
 0x240   : > { %5048 = vmatprep.subr.bf16.mxu1 %v5272_v55 }
 0x243   : > { %5049 = vmatpush3.bf16.msra.mxu1 %v5272_v55 }
 0x244   : > { %5054 = vmatprep.subr.bf16.mxu1 %v5273_v49 }
 0x24a   : > { %5051 = vmatmul.mubr.msk.bf16.vlgmr.msra.gmra.mrb[4].mxu1 %vm398_vm3, %v6589_v58 }
 0x24b   : > { %5055 = vmatpush3.bf16.msra.mxu1 %v5273_v49  ;;  %5058 = vmatprep.mubr.msk.bf16.mxu1 %vm398_vm3, %v4209_v31 }
 0x24c   : > { %5056 = vmatprep.subr.bf16.mxu1 %v5274_v23 }
 0x24f   : > { %5057 = vmatpush3.bf16.msra.mxu1 %v5274_v23 }
 0x256   : > { %5059 = vmatmul.mubr.msk.bf16.vlgmr.msra.gmra.mrb[4].mxu1 %vm398_vm3, %v6614_v44 }
 0x329   : > { %v5060_v40 = vpop.f32.mrb[4].mxu1 }
 0x32a   : > { %4323 = vst.msk [vmem:[%s227_s14 + $0x10] sm:$0xff] %vm4320_vm15, %v5060_v40  ;;  %v4301_v32 = vpop.f32.mrb[5].mxu1 }
 0x32b   : > { %4321 = vst.msk [vmem:[%s227_s14] sm:$0xff] %vm4320_vm15, %v4301_v32  ;;  %v5061_v43 = vpop.f32.mrb[6].mxu1 }
 0x32c   : > { %4325 = vst.msk [vmem:[%s227_s14 + $0x18] sm:$0x1] %vm4324_vm0, %v5061_v43  ;;  %v4304_v11 = vpop.f32.mrb[7].mxu1 }
 0x32d   : > { %4322 = vst.msk [vmem:[%s227_s14 + $0x8] sm:$0xff] %vm4320_vm15, %v4304_v11 }
 0x32e PF: > { %s14_s17 = sadd.s32 1, %s5297_s17   ;;  %s6811_s15 = smov %s5293_s16 }
 0x32f   : > { %p11_p5 = scmp.ge.s32.totalorder %s14_s17, 4   ;;  %s6812_s16 = smov %s6814_s18 }
 0x331   :  { %13 = sbr.rel (!%p11_p5) target bundleno = 2 (0x2), region = 89 }

</bundles_post_ra>
